<compile_context>
chip_gen: v7x
topology: tpu7x:2x2x1
jax: 0.10.0
libtpu: 0.0.40
codegen_flags: <defaults>
</compile_context>

<pallas_src>
import functools
import math

import jax
import jax.numpy as jnp
from jax.experimental import pallas as pl
from jax.experimental.pallas import tpu as pltpu

BN_EPS = 1e-5
MAX_TM = 1024          # VMEM is nowhere near binding at these channel counts.


def _round_up(x, m):
    return ((x + m - 1) // m) * m


def _tiles_for(m):
    """Row tiling: >=2 tiles when possible (pipelining / v7x megacore); padding
    never exceeds 7 rows per tile (fixes the old near-2x pad blow-up)."""
    nt = max(2, -(-m // MAX_TM)) if m >= 16 else 1
    tm = _round_up(-(-m // nt), 8)
    return tm, tm * nt, nt


# ----------------------------------------------------------------------------- kernels
def _conv_stats_kernel(x_ref, w_ref, b_ref, y_ref, s1_ref, s2_ref):
    """Pass 1 of Conv1x1(+folded bias)+BN: bf16 matmul (f32 accumulate), store the
    result once, and accumulate per-channel sum / sum-of-squares across the grid."""
    @pl.when(pl.program_id(0) == 0)
    def _init():
        s1_ref[...] = jnp.zeros_like(s1_ref)
        s2_ref[...] = jnp.zeros_like(s2_ref)

    acc = jnp.dot(x_ref[...], w_ref[...], preferred_element_type=jnp.float32)
    acc = acc + b_ref[...]
    y_ref[...] = acc
    s1_ref[...] += jnp.sum(acc, axis=0, keepdims=True)
    s2_ref[...] += jnp.sum(acc * acc, axis=0, keepdims=True)


def _bn_act_matmul_kernel(*refs, act, with_mul):
    """Pass 2: per-channel scale/shift + activation on the stored conv result,
    fused with the following bf16 matmul (+bias) and an optional elementwise mul."""
    if with_mul:
        y_ref, scale_ref, shift_ref, w_ref, b_ref, mul_ref, o_ref = refs
    else:
        y_ref, scale_ref, shift_ref, w_ref, b_ref, o_ref = refs
    a = y_ref[...] * scale_ref[...] + shift_ref[...]
    if act == "leaky_relu":
        a = jnp.where(a >= 0.0, a, 0.2 * a)
    elif act == "sigmoid":
        a = pl.reciprocal(1.0 + jnp.exp(-a), approx=True)
    out = jnp.dot(a.astype(jnp.bfloat16), w_ref[...],
                  preferred_element_type=jnp.float32) + b_ref[...]
    if with_mul:
        out = out * mul_ref[...]
    o_ref[...] = out


def _attn_kernel(q_ref, k_ref, v_ref, o_ref, *, scale):
    """softmax(q k^T / sqrt(d_k)) v for one (batch, head); head dim kept at its
    true size (no 128-lane padding)."""
    q = q_ref[0]
    k = k_ref[0]
    v = v_ref[0]
    s = jax.lax.dot_general(q, k, (((1,), (1,)), ((), ())),
                            preferred_element_type=jnp.float32) * scale
    s = s - jnp.max(s, axis=-1, keepdims=True)
    e = jnp.exp(s)
    p = e * pl.reciprocal(jnp.sum(e, axis=-1, keepdims=True), approx=True)
    o_ref[0] = jnp.dot(p, v, preferred_element_type=jnp.float32)


# ---------------------------------------------------------------------------- wrappers
def conv1x1_stats(x, w, bias):
    """Fused 1x1-conv (bf16 matmul, f32 accumulate) + BN batch-statistics pass.

    Returns the row-padded f32 matmul result, exact per-channel mean/var over the
    true m rows, and the tiling used (so pass 2 reuses the same padded layout).
    Zero-padded rows evaluate to exactly `bias`; their stats contribution is
    subtracted here, keeping the batch statistics exact under row tiling.
    """
    m, k = x.shape
    n = w.shape[1]
    tm, mp, nt = _tiles_for(m)
    xp = jnp.pad(x, ((0, mp - m), (0, 0))).astype(jnp.bfloat16)
    wb = w.astype(jnp.bfloat16)
    b2 = bias.reshape(1, n).astype(jnp.float32)

    y, s1, s2 = pl.pallas_call(
        _conv_stats_kernel,
        out_shape=(jax.ShapeDtypeStruct((mp, n), jnp.float32),
                   jax.ShapeDtypeStruct((1, n), jnp.float32),
                   jax.ShapeDtypeStruct((1, n), jnp.float32)),
        grid=(nt,),
        in_specs=[pl.BlockSpec((tm, k), lambda i: (i, 0)),
                  pl.BlockSpec((k, n), lambda i: (0, 0)),
                  pl.BlockSpec((1, n), lambda i: (0, 0))],
        out_specs=(pl.BlockSpec((tm, n), lambda i: (i, 0)),
                   pl.BlockSpec((1, n), lambda i: (0, 0)),
                   pl.BlockSpec((1, n), lambda i: (0, 0))),
        compiler_params=pltpu.CompilerParams(dimension_semantics=("arbitrary",)),
    )(xp, wb, b2)

    pad_rows = mp - m
    s1 = s1[0] - pad_rows * b2[0]
    s2 = s2[0] - pad_rows * b2[0] * b2[0]
    mean = s1 / m
    # TODO(synk): E[y^2]-E[y]^2 can cancel for large-mean activations; a
    # mean-subtracted second reduction would be more robust if that ever matters.
    var = jnp.maximum(s2 / m - mean * mean, 0.0)
    return y, mean, var, (tm, mp, nt)


def _bn_scale_shift(mean, var, gamma, beta):
    scale = gamma.astype(jnp.float32) * jax.lax.rsqrt(var + BN_EPS)
    shift = beta.astype(jnp.float32) - mean * scale
    return scale, shift


def bn_act_matmul(y, scale, shift, w, bias, tiles, act, mul=None):
    """BN affine + activation epilogue fused with the next matmul (+bias) and an
    optional trailing elementwise multiply. `y` / `mul` are already row-padded."""
    tm, mp, nt = tiles
    ny = y.shape[1]
    n_out = w.shape[1]
    in_specs = [pl.BlockSpec((tm, ny), lambda i: (i, 0)),
                pl.BlockSpec((1, ny), lambda i: (0, 0)),
                pl.BlockSpec((1, ny), lambda i: (0, 0)),
                pl.BlockSpec((ny, n_out), lambda i: (0, 0)),
                pl.BlockSpec((1, n_out), lambda i: (0, 0))]
    args = [y, scale.reshape(1, ny).astype(jnp.float32),
            shift.reshape(1, ny).astype(jnp.float32),
            w.astype(jnp.bfloat16), bias.reshape(1, n_out).astype(jnp.float32)]
    if mul is not None:
        in_specs.append(pl.BlockSpec((tm, n_out), lambda i: (i, 0)))
        args.append(mul.astype(jnp.float32))
    return pl.pallas_call(
        functools.partial(_bn_act_matmul_kernel, act=act, with_mul=mul is not None),
        out_shape=jax.ShapeDtypeStruct((mp, n_out), jnp.float32),
        grid=(nt,),
        in_specs=in_specs,
        out_specs=pl.BlockSpec((tm, n_out), lambda i: (i, 0)),
        compiler_params=pltpu.CompilerParams(dimension_semantics=("parallel",)),
    )(*args)


def attention_heads(q, k, v, d_k):
    """Per-(batch*head) softmax attention; blocks keep the true d_k lane width."""
    bh, l, dk = q.shape
    # TODO(synk): materializes the full [l, l] score tile per (batch, head); switch
    # to a flash-style kv-tiled online softmax if l grows enough to pressure VMEM.
    return pl.pallas_call(
        functools.partial(_attn_kernel, scale=1.0 / math.sqrt(d_k)),
        out_shape=jax.ShapeDtypeStruct((bh, l, dk), jnp.float32),
        grid=(bh,),
        in_specs=[pl.BlockSpec((1, l, dk), lambda i: (i, 0, 0))] * 3,
        out_specs=pl.BlockSpec((1, l, dk), lambda i: (i, 0, 0)),
        compiler_params=pltpu.CompilerParams(dimension_semantics=("parallel",)),
    )(q, k, v)


# --------------------------------------------------------------------- module forward
def positional_encoding_2d(d_model, height, width):
    if d_model % 4 != 0:
        raise ValueError("d_model must be divisible by 4")
    dm = d_model // 2
    div_term = jnp.exp(jnp.arange(0.0, dm, 2.0) * -(math.log(10000.0) / dm))
    pos_w = jnp.arange(0.0, width)[:, None]
    pos_h = jnp.arange(0.0, height)[:, None]
    pe = jnp.zeros((d_model, height, width), jnp.float32)
    pe = pe.at[0:dm:2].set(jnp.broadcast_to(jnp.sin(pos_w * div_term).T[:, None, :],
                                            (dm // 2, height, width)))
    pe = pe.at[1:dm:2].set(jnp.broadcast_to(jnp.cos(pos_w * div_term).T[:, None, :],
                                            (dm // 2, height, width)))
    pe = pe.at[dm::2].set(jnp.broadcast_to(jnp.sin(pos_h * div_term).T[:, :, None],
                                           (dm // 2, height, width)))
    pe = pe.at[dm + 1::2].set(jnp.broadcast_to(jnp.cos(pos_h * div_term).T[:, :, None],
                                               (dm // 2, height, width)))
    return pe


def mhca_block_forward(Y, S, params, heads):
    """MHCABlock.forward (pos_enc=True, dropout=0, training-mode BatchNorm)."""
    b, yc, yh, yw = Y.shape
    _, c, sh, sw = S.shape
    assert sh == 2 * yh and sw == 2 * yw and yc == 2 * c

    S = S + positional_encoding_2d(c, sh, sw)[None]
    Y = Y + positional_encoding_2d(yc, yh, yw)[None]

    # Channels-last internally so the (small) channel axis is the lane axis; block
    # shapes use the true channel widths, so nothing is zero-padded to 128 lanes.
    s_nhwc = jnp.transpose(S, (0, 2, 3, 1)).astype(jnp.float32)   # [B, Sh, Sw, C]
    y_nhwc = jnp.transpose(Y, (0, 2, 3, 1)).astype(jnp.float32)   # [B, Yh, Yw, 2C]

    s_pool = s_nhwc.reshape(b, yh, 2, yw, 2, c).max(axis=(2, 4))  # MaxPool2d(2)

    m = b * yh * yw
    l = yh * yw
    d_k = c // heads

    # ---- Pallas call 1: conv_S and conv_Y 1x1 convs as ONE block-diagonal matmul,
    # emitting the raw result + BN batch statistics in the same pass.
    x_sy = jnp.concatenate([s_pool.reshape(m, c), y_nhwc.reshape(m, yc)], axis=1)
    w_sy = jnp.zeros((c + yc, 2 * c), jnp.float32)
    w_sy = w_sy.at[:c, :c].set(params["w_s"])
    w_sy = w_sy.at[c:, c:].set(params["w_y"])
    y_sy, mean_sy, var_sy, tiles = conv1x1_stats(
        x_sy, w_sy, jnp.zeros((2 * c,), jnp.float32))
    scale_sy, shift_sy = _bn_scale_shift(
        mean_sy, var_sy,
        jnp.concatenate([params["g_s"], params["g_y"]]),
        jnp.concatenate([params["b_s"], params["b_y"]]))

    # ---- Pallas call 2: BN + LeakyReLU epilogue fused with the q/k/v projections
    # (block-diagonal weight; y_sy cols [0:c] feed v, cols [c:2c] feed q and k).
    w_qkv = jnp.zeros((2 * c, 3 * c), jnp.float32)
    w_qkv = w_qkv.at[c:, :c].set(params["wq"])
    w_qkv = w_qkv.at[c:, c:2 * c].set(params["wk"])
    w_qkv = w_qkv.at[:c, 2 * c:].set(params["wv"])
    b_qkv = jnp.concatenate([params["bq"], params["bk"], params["bv"]])
    qkv = bn_act_matmul(y_sy, scale_sy, shift_sy, w_qkv, b_qkv, tiles,
                        "leaky_relu")[:m]

    # ---- Pallas call 3: attention per (batch, head); true d_k lanes, no padding.
    def split_heads(t):
        return (t.reshape(b, l, heads, d_k).transpose(0, 2, 1, 3)
                 .reshape(b * heads, l, d_k))
    att = attention_heads(split_heads(qkv[:, :c]),
                          split_heads(qkv[:, c:2 * c]),
                          split_heads(qkv[:, 2 * c:]), d_k)
    concat = att.reshape(b, heads, l, d_k).transpose(0, 2, 1, 3).reshape(m, c)

    # ---- Pallas call 4: the MHA output projection and block_Z's 1x1 conv are two
    # back-to-back linear maps -> fold (wo @ w_z, bo @ w_z) into one matmul + stats.
    y_z, mean_z, var_z, tiles_z = conv1x1_stats(
        concat, params["wo"] @ params["w_z"], params["bo"] @ params["w_z"])
    scale_z, shift_z = _bn_scale_shift(mean_z, var_z, params["g_z"], params["b_z"])

    # ---- Pallas call 5: BN + Sigmoid epilogue fused with ConvTranspose2d(k=2, s=2)
    # (matmul over the 4 (i, j) output taps) and the trailing elementwise * S.
    n4 = 4 * c
    w_ct2 = jnp.transpose(params["w_ct"], (0, 2, 3, 1)).reshape(c, n4)
    b_ct2 = jnp.tile(params["b_ct"], 4)
    s_r = (s_nhwc.reshape(b, yh, 2, yw, 2, c).transpose(0, 1, 3, 2, 4, 5)
           .reshape(m, n4))
    s_rp = jnp.pad(s_r, ((0, tiles_z[1] - m), (0, 0)))
    out = bn_act_matmul(y_z, scale_z, shift_z, w_ct2, b_ct2, tiles_z,
                        "sigmoid", mul=s_rp)[:m]
    out = (out.reshape(b, yh, yw, 2, 2, c).transpose(0, 1, 3, 2, 4, 5)
           .reshape(b, sh, sw, c))
    return jnp.transpose(out, (0, 3, 1, 2))                        # back to NCHW


# -------------------------------------------------------------------------- reference
def _reference(Y, S, params, heads):
    hp = jax.lax.Precision.HIGHEST
    b, yc, yh, yw = Y.shape
    _, c, sh, sw = S.shape
    S = S + positional_encoding_2d(c, sh, sw)[None]
    Y = Y + positional_encoding_2d(yc, yh, yw)[None]

    def bn(x, gamma, beta):
        mean = jnp.mean(x, axis=(0, 2, 3), keepdims=True)
        var = jnp.mean((x - mean) ** 2, axis=(0, 2, 3), keepdims=True)
        xn = (x - mean) * jax.lax.rsqrt(var + BN_EPS)
        return xn * gamma.reshape(1, -1, 1, 1) + beta.reshape(1, -1, 1, 1)

    def conv1x1(x, w):
        return jnp.einsum("nchw,cd->ndhw", x, w, precision=hp)

    def leaky(x):
        return jnp.where(x >= 0, x, 0.2 * x)

    s_pool = S.reshape(b, c, yh, 2, yw, 2).max(axis=(3, 5))
    v = leaky(bn(conv1x1(s_pool, params["w_s"]), params["g_s"], params["b_s"]))
    kq = leaky(bn(conv1x1(Y, params["w_y"]), params["g_y"], params["b_y"]))
    l = yh * yw
    v = v.reshape(b, c, l).transpose(0, 2, 1)
    kq = kq.reshape(b, c, l).transpose(0, 2, 1)

    d_k = c // heads

    def lin(x, w, bias):
        return jnp.einsum("blc,cd->bld", x, w, precision=hp) + bias

    def heads_split(t):
        return t.reshape(b, l, heads, d_k).transpose(0, 2, 1, 3)

    q = heads_split(lin(kq, params["wq"], params["bq"]))
    k = heads_split(lin(kq, params["wk"], params["bk"]))
    vv = heads_split(lin(v, params["wv"], params["bv"]))
    scores = jnp.einsum("bhqd,bhkd->bhqk", q, k, precision=hp) / math.sqrt(d_k)
    p = jax.nn.softmax(scores, axis=-1)
    att = jnp.einsum("bhqk,bhkd->bhqd", p, vv, precision=hp)
    concat = att.transpose(0, 2, 1, 3).reshape(b, l, c)
    z = lin(concat, params["wo"], params["bo"]).transpose(0, 2, 1).reshape(b, c, yh, yw)

    z = jax.nn.sigmoid(bn(conv1x1(z, params["w_z"]), params["g_z"], params["b_z"]))
    ct = jnp.einsum("nchw,cdij->ndhiwj", z, params["w_ct"], precision=hp)
    ct = ct.reshape(b, c, sh, sw) + params["b_ct"].reshape(1, -1, 1, 1)
    return ct * S


if __name__ == "__main__":
    key = jax.random.PRNGKey(0)
    keys = jax.random.split(key, 16)

    batch, channels, heads = 2, 16, 4
    yh = yw = 8
    sh, sw = 2 * yh, 2 * yw

    Y = jax.random.normal(keys[0], (batch, 2 * channels, yh, yw), jnp.float32)
    S = jax.random.normal(keys[1], (batch, channels, sh, sw), jnp.float32)

    def _w(k, shape, scale=0.2):
        return scale * jax.random.normal(k, shape, jnp.float32)

    params = {
        "w_s": _w(keys[2], (channels, channels)),
        "g_s": jnp.ones((channels,), jnp.float32),
        "b_s": jnp.zeros((channels,), jnp.float32),
        "w_y": _w(keys[3], (2 * channels, channels)),
        "g_y": jnp.ones((channels,), jnp.float32),
        "b_y": jnp.zeros((channels,), jnp.float32),
        "wq": _w(keys[4], (channels, channels)),
        "bq": _w(keys[5], (channels,), 0.1),
        "wk": _w(keys[6], (channels, channels)),
        "bk": _w(keys[7], (channels,), 0.1),
        "wv": _w(keys[8], (channels, channels)),
        "bv": _w(keys[9], (channels,), 0.1),
        "wo": _w(keys[10], (channels, channels)),
        "bo": _w(keys[11], (channels,), 0.1),
        "w_z": _w(keys[12], (channels, channels)),
        "g_z": jnp.ones((channels,), jnp.float32),
        "b_z": jnp.zeros((channels,), jnp.float32),
        "w_ct": _w(keys[13], (channels, channels, 2, 2)),
        "b_ct": _w(keys[14], (channels,), 0.1),
    }

    fwd = jax.jit(functools.partial(mhca_block_forward, heads=heads))
    out = jax.block_until_ready(fwd(Y, S, params))

    ref = jax.block_until_ready(_reference(Y, S, params, heads))
    assert out.shape == (batch, channels, sh, sw), out.shape
    max_err = float(jnp.max(jnp.abs(out - ref)))
    # Tolerance accounts for bf16 MXU operands (f32 accumulation / f32 BN stats).
    assert jnp.allclose(out, ref, rtol=3e-2, atol=3e-2), f"mismatch: {max_err}"

    print("KERNEL_OK")
</pallas_src>

<mosaic_0001>
module attributes {stable_mosaic.version = 11 : i64} {
  func.func @_conv_stats_kernel(%arg0: i32, %arg1: memref<64x48xbf16, #tpu.memory_space<vmem>>, %arg2: memref<48x32xbf16, #tpu.memory_space<vmem>>, %arg3: memref<1x32xf32, #tpu.memory_space<vmem>>, %arg4: memref<64x32xf32, #tpu.memory_space<vmem>>, %arg5: memref<1x32xf32, #tpu.memory_space<vmem>>, %arg6: memref<1x32xf32, #tpu.memory_space<vmem>>) attributes {dimension_semantics = [#tpu.dimension_semantics<arbitrary>], iteration_bounds = array<i64: 2>, scalar_prefetch = 0 : i64, scratch_operands = 0 : i64, tpu.core_type = #tpu.core_type<tc>, window_params = [{transform_indices = @transform_0, window_bounds = array<i64: 64, 48>}, {pipeline_mode = #tpu.pipeline_mode<synchronous>, transform_indices = @transform_1, window_bounds = array<i64: 48, 32>}, {pipeline_mode = #tpu.pipeline_mode<synchronous>, transform_indices = @transform_2, window_bounds = array<i64: 1, 32>}, {transform_indices = @transform_3, window_bounds = array<i64: 64, 32>}, {pipeline_mode = #tpu.pipeline_mode<synchronous>, transform_indices = @transform_4, window_bounds = array<i64: 1, 32>}, {pipeline_mode = #tpu.pipeline_mode<synchronous>, transform_indices = @transform_5, window_bounds = array<i64: 1, 32>}]} {
    %c0_i32 = arith.constant 0 : i32
    %0 = arith.cmpi eq, %arg0, %c0_i32 : i32
    %1 = arith.extui %0 : i1 to i32
    %c0_i32_0 = arith.constant 0 : i32
    %2 = arith.cmpi ne, %1, %c0_i32_0 : i32
    scf.if %2 {
      %cst_18 = arith.constant 0.000000e+00 : f32
      %21 = vector.broadcast %cst_18 : f32 to vector<1x32xf32>
      %c0_19 = arith.constant 0 : index
      %c0_20 = arith.constant 0 : index
      %22 = vector.load %arg5[%c0_19, %c0_20] : memref<1x32xf32, #tpu.memory_space<vmem>>, vector<1x32xf32>
      tpu.vector_store %arg5[%c0_19, %c0_20], %21 {strides = array<i32>} : memref<1x32xf32, #tpu.memory_space<vmem>>, vector<1x32xf32>,
      %cst_21 = arith.constant 0.000000e+00 : f32
      %23 = vector.broadcast %cst_21 : f32 to vector<1x32xf32>
      %c0_22 = arith.constant 0 : index
      %c0_23 = arith.constant 0 : index
      %24 = vector.load %arg6[%c0_22, %c0_23] : memref<1x32xf32, #tpu.memory_space<vmem>>, vector<1x32xf32>
      tpu.vector_store %arg6[%c0_22, %c0_23], %23 {strides = array<i32>} : memref<1x32xf32, #tpu.memory_space<vmem>>, vector<1x32xf32>,
    } else {
    }
    %c0 = arith.constant 0 : index
    %c0_1 = arith.constant 0 : index
    %3 = vector.load %arg1[%c0, %c0_1] : memref<64x48xbf16, #tpu.memory_space<vmem>>, vector<64x48xbf16>
    %c0_2 = arith.constant 0 : index
    %c0_3 = arith.constant 0 : index
    %4 = vector.load %arg2[%c0_2, %c0_3] : memref<48x32xbf16, #tpu.memory_space<vmem>>, vector<48x32xbf16>
    %cst = arith.constant dense<0.000000e+00> : vector<64x32xf32>
    %5 = tpu.matmul %3, %4, %cst {dimension_numbers = #tpu.dot_dimension_numbers<[1], [0], [0], [1], [0, 0, 1, 1], [], []>} : vector<64x48xbf16>, vector<48x32xbf16>, vector<64x32xf32> -> vector<64x32xf32>
    %c0_4 = arith.constant 0 : index
    %c0_5 = arith.constant 0 : index
    %6 = vector.load %arg3[%c0_4, %c0_5] : memref<1x32xf32, #tpu.memory_space<vmem>>, vector<1x32xf32>
    %7 = vector.broadcast %6 : vector<1x32xf32> to vector<64x32xf32>
    %8 = arith.addf %5, %7 : vector<64x32xf32>
    %c0_6 = arith.constant 0 : index
    %c0_7 = arith.constant 0 : index
    %9 = vector.load %arg4[%c0_6, %c0_7] : memref<64x32xf32, #tpu.memory_space<vmem>>, vector<64x32xf32>
    tpu.vector_store %arg4[%c0_6, %c0_7], %8 {strides = array<i32>} : memref<64x32xf32, #tpu.memory_space<vmem>>, vector<64x32xf32>,
    %c0_8 = arith.constant 0 : index
    %c0_9 = arith.constant 0 : index
    %10 = vector.load %arg5[%c0_8, %c0_9] : memref<1x32xf32, #tpu.memory_space<vmem>>, vector<1x32xf32>
    %cst_10 = arith.constant dense<0.000000e+00> : vector<32xf32>
    %11 = vector.multi_reduction <add>, %8, %cst_10 [0] : vector<64x32xf32> to vector<32xf32>
    %12 = vector.shape_cast %11 : vector<32xf32> to vector<1x32xf32>
    %13 = arith.addf %10, %12 : vector<1x32xf32>
    %c0_11 = arith.constant 0 : index
    %c0_12 = arith.constant 0 : index
    %14 = vector.load %arg5[%c0_11, %c0_12] : memref<1x32xf32, #tpu.memory_space<vmem>>, vector<1x32xf32>
    tpu.vector_store %arg5[%c0_11, %c0_12], %13 {strides = array<i32>} : memref<1x32xf32, #tpu.memory_space<vmem>>, vector<1x32xf32>,
    %c0_13 = arith.constant 0 : index
    %c0_14 = arith.constant 0 : index
    %15 = vector.load %arg6[%c0_13, %c0_14] : memref<1x32xf32, #tpu.memory_space<vmem>>, vector<1x32xf32>
    %16 = arith.mulf %8, %8 : vector<64x32xf32>
    %cst_15 = arith.constant dense<0.000000e+00> : vector<32xf32>
    %17 = vector.multi_reduction <add>, %16, %cst_15 [0] : vector<64x32xf32> to vector<32xf32>
    %18 = vector.shape_cast %17 : vector<32xf32> to vector<1x32xf32>
    %19 = arith.addf %15, %18 : vector<1x32xf32>
    %c0_16 = arith.constant 0 : index
    %c0_17 = arith.constant 0 : index
    %20 = vector.load %arg6[%c0_16, %c0_17] : memref<1x32xf32, #tpu.memory_space<vmem>>, vector<1x32xf32>
    tpu.vector_store %arg6[%c0_16, %c0_17], %19 {strides = array<i32>} : memref<1x32xf32, #tpu.memory_space<vmem>>, vector<1x32xf32>,
    return
  }
  func.func @transform_0(%arg0: i32) -> (i32, i32) {
    %c0_i32 = arith.constant 0 : i32
    %c0_i32_0 = arith.constant 0 : i32
    return %arg0, %c0_i32 : i32, i32
  }
  func.func @transform_1(%arg0: i32) -> (i32, i32) {
    %c0_i32 = arith.constant 0 : i32
    %c0_i32_0 = arith.constant 0 : i32
    %c0_i32_1 = arith.constant 0 : i32
    return %c0_i32, %c0_i32_0 : i32, i32
  }
  func.func @transform_2(%arg0: i32) -> (i32, i32) {
    %c0_i32 = arith.constant 0 : i32
    %c0_i32_0 = arith.constant 0 : i32
    %c0_i32_1 = arith.constant 0 : i32
    return %c0_i32, %c0_i32_0 : i32, i32
  }
  func.func @transform_3(%arg0: i32) -> (i32, i32) {
    %c0_i32 = arith.constant 0 : i32
    %c0_i32_0 = arith.constant 0 : i32
    return %arg0, %c0_i32 : i32, i32
  }
  func.func @transform_4(%arg0: i32) -> (i32, i32) {
    %c0_i32 = arith.constant 0 : i32
    %c0_i32_0 = arith.constant 0 : i32
    %c0_i32_1 = arith.constant 0 : i32
    return %c0_i32, %c0_i32_0 : i32, i32
  }
  func.func @transform_5(%arg0: i32) -> (i32, i32) {
    %c0_i32 = arith.constant 0 : i32
    %c0_i32_0 = arith.constant 0 : i32
    %c0_i32_1 = arith.constant 0 : i32
    return %c0_i32, %c0_i32_0 : i32, i32
  }
}

module attributes {stable_mosaic.version = 11 : i64} {
  func.func @_bn_act_matmul_kernel(%arg0: i32, %arg1: memref<64x32xf32, #tpu.memory_space<vmem>>, %arg2: memref<1x32xf32, #tpu.memory_space<vmem>>, %arg3: memref<1x32xf32, #tpu.memory_space<vmem>>, %arg4: memref<32x48xbf16, #tpu.memory_space<vmem>>, %arg5: memref<1x48xf32, #tpu.memory_space<vmem>>, %arg6: memref<64x48xf32, #tpu.memory_space<vmem>>) attributes {dimension_semantics = [#tpu.dimension_semantics<parallel>], iteration_bounds = array<i64: 2>, scalar_prefetch = 0 : i64, scratch_operands = 0 : i64, tpu.core_type = #tpu.core_type<tc>, window_params = [{transform_indices = @transform_0, window_bounds = array<i64: 64, 32>}, {pipeline_mode = #tpu.pipeline_mode<synchronous>, transform_indices = @transform_1, window_bounds = array<i64: 1, 32>}, {pipeline_mode = #tpu.pipeline_mode<synchronous>, transform_indices = @transform_2, window_bounds = array<i64: 1, 32>}, {pipeline_mode = #tpu.pipeline_mode<synchronous>, transform_indices = @transform_3, window_bounds = array<i64: 32, 48>}, {pipeline_mode = #tpu.pipeline_mode<synchronous>, transform_indices = @transform_4, window_bounds = array<i64: 1, 48>}, {transform_indices = @transform_5, window_bounds = array<i64: 64, 48>}]} {
    %c0 = arith.constant 0 : index
    %c0_0 = arith.constant 0 : index
    %0 = vector.load %arg1[%c0, %c0_0] : memref<64x32xf32, #tpu.memory_space<vmem>>, vector<64x32xf32>
    %c0_1 = arith.constant 0 : index
    %c0_2 = arith.constant 0 : index
    %1 = vector.load %arg2[%c0_1, %c0_2] : memref<1x32xf32, #tpu.memory_space<vmem>>, vector<1x32xf32>
    %2 = vector.broadcast %1 : vector<1x32xf32> to vector<64x32xf32>
    %3 = arith.mulf %0, %2 : vector<64x32xf32>
    %c0_3 = arith.constant 0 : index
    %c0_4 = arith.constant 0 : index
    %4 = vector.load %arg3[%c0_3, %c0_4] : memref<1x32xf32, #tpu.memory_space<vmem>>, vector<1x32xf32>
    %5 = vector.broadcast %4 : vector<1x32xf32> to vector<64x32xf32>
    %6 = arith.addf %3, %5 : vector<64x32xf32>
    %cst = arith.constant 0.000000e+00 : f32
    %7 = vector.broadcast %cst : f32 to vector<64x32xf32>
    %8 = arith.cmpf oge, %6, %7 : vector<64x32xf32>
    %cst_5 = arith.constant 2.000000e-01 : f32
    %9 = vector.broadcast %cst_5 : f32 to vector<64x32xf32>
    %10 = arith.mulf %9, %6 : vector<64x32xf32>
    %11 = arith.select %8, %6, %10 : vector<64x32xi1>, vector<64x32xf32>
    %12 = arith.truncf %11 : vector<64x32xf32> to vector<64x32xbf16>
    %c0_6 = arith.constant 0 : index
    %c0_7 = arith.constant 0 : index
    %13 = vector.load %arg4[%c0_6, %c0_7] : memref<32x48xbf16, #tpu.memory_space<vmem>>, vector<32x48xbf16>
    %cst_8 = arith.constant dense<0.000000e+00> : vector<64x48xf32>
    %14 = tpu.matmul %12, %13, %cst_8 {dimension_numbers = #tpu.dot_dimension_numbers<[1], [0], [0], [1], [0, 0, 1, 1], [], []>} : vector<64x32xbf16>, vector<32x48xbf16>, vector<64x48xf32> -> vector<64x48xf32>
    %c0_9 = arith.constant 0 : index
    %c0_10 = arith.constant 0 : index
    %15 = vector.load %arg5[%c0_9, %c0_10] : memref<1x48xf32, #tpu.memory_space<vmem>>, vector<1x48xf32>
    %16 = vector.broadcast %15 : vector<1x48xf32> to vector<64x48xf32>
    %17 = arith.addf %14, %16 : vector<64x48xf32>
    %c0_11 = arith.constant 0 : index
    %c0_12 = arith.constant 0 : index
    %18 = vector.load %arg6[%c0_11, %c0_12] : memref<64x48xf32, #tpu.memory_space<vmem>>, vector<64x48xf32>
    tpu.vector_store %arg6[%c0_11, %c0_12], %17 {strides = array<i32>} : memref<64x48xf32, #tpu.memory_space<vmem>>, vector<64x48xf32>,
    return
  }
  func.func @transform_0(%arg0: i32) -> (i32, i32) {
    %c0_i32 = arith.constant 0 : i32
    %c0_i32_0 = arith.constant 0 : i32
    return %arg0, %c0_i32 : i32, i32
  }
  func.func @transform_1(%arg0: i32) -> (i32, i32) {
    %c0_i32 = arith.constant 0 : i32
    %c0_i32_0 = arith.constant 0 : i32
    %c0_i32_1 = arith.constant 0 : i32
    return %c0_i32, %c0_i32_0 : i32, i32
  }
  func.func @transform_2(%arg0: i32) -> (i32, i32) {
    %c0_i32 = arith.constant 0 : i32
    %c0_i32_0 = arith.constant 0 : i32
    %c0_i32_1 = arith.constant 0 : i32
    return %c0_i32, %c0_i32_0 : i32, i32
  }
  func.func @transform_3(%arg0: i32) -> (i32, i32) {
    %c0_i32 = arith.constant 0 : i32
    %c0_i32_0 = arith.constant 0 : i32
    %c0_i32_1 = arith.constant 0 : i32
    return %c0_i32, %c0_i32_0 : i32, i32
  }
  func.func @transform_4(%arg0: i32) -> (i32, i32) {
    %c0_i32 = arith.constant 0 : i32
    %c0_i32_0 = arith.constant 0 : i32
    %c0_i32_1 = arith.constant 0 : i32
    return %c0_i32, %c0_i32_0 : i32, i32
  }
  func.func @transform_5(%arg0: i32) -> (i32, i32) {
    %c0_i32 = arith.constant 0 : i32
    %c0_i32_0 = arith.constant 0 : i32
    return %arg0, %c0_i32 : i32, i32
  }
}

module attributes {stable_mosaic.version = 11 : i64} {
  func.func @_attn_kernel(%arg0: i32, %arg1: memref<1x64x4xf32, #tpu.memory_space<vmem>>, %arg2: memref<1x64x4xf32, #tpu.memory_space<vmem>>, %arg3: memref<1x64x4xf32, #tpu.memory_space<vmem>>, %arg4: memref<1x64x4xf32, #tpu.memory_space<vmem>>) attributes {dimension_semantics = [#tpu.dimension_semantics<parallel>], iteration_bounds = array<i64: 8>, scalar_prefetch = 0 : i64, scratch_operands = 0 : i64, tpu.core_type = #tpu.core_type<tc>, window_params = [{transform_indices = @transform_0, window_bounds = array<i64: 1, 64, 4>}, {transform_indices = @transform_1, window_bounds = array<i64: 1, 64, 4>}, {transform_indices = @transform_2, window_bounds = array<i64: 1, 64, 4>}, {transform_indices = @transform_3, window_bounds = array<i64: 1, 64, 4>}]} {
    %c0 = arith.constant 0 : index
    %c0_0 = arith.constant 0 : index
    %c0_1 = arith.constant 0 : index
    %0 = vector.load %arg1[%c0, %c0_0, %c0_1] : memref<1x64x4xf32, #tpu.memory_space<vmem>>, vector<1x64x4xf32>
    %1 = vector.shape_cast %0 : vector<1x64x4xf32> to vector<64x4xf32>
    %c0_2 = arith.constant 0 : index
    %c0_3 = arith.constant 0 : index
    %c0_4 = arith.constant 0 : index
    %2 = vector.load %arg2[%c0_2, %c0_3, %c0_4] : memref<1x64x4xf32, #tpu.memory_space<vmem>>, vector<1x64x4xf32>
    %3 = vector.shape_cast %2 : vector<1x64x4xf32> to vector<64x4xf32>
    %c0_5 = arith.constant 0 : index
    %c0_6 = arith.constant 0 : index
    %c0_7 = arith.constant 0 : index
    %4 = vector.load %arg3[%c0_5, %c0_6, %c0_7] : memref<1x64x4xf32, #tpu.memory_space<vmem>>, vector<1x64x4xf32>
    %5 = vector.shape_cast %4 : vector<1x64x4xf32> to vector<64x4xf32>
    %cst = arith.constant dense<0.000000e+00> : vector<64x64xf32>
    %6 = tpu.matmul %1, %3, %cst {dimension_numbers = #tpu.dot_dimension_numbers<[1], [1], [0], [0], [0, 0, 1, 0], [], []>} : vector<64x4xf32>, vector<64x4xf32>, vector<64x64xf32> -> vector<64x64xf32>
    %cst_8 = arith.constant 5.000000e-01 : f32
    %7 = vector.broadcast %cst_8 : f32 to vector<64x64xf32>
    %8 = arith.mulf %6, %7 : vector<64x64xf32>
    %cst_9 = arith.constant dense<0xFF800000> : vector<64xf32>
    %9 = vector.multi_reduction <maximumf>, %8, %cst_9 [1] : vector<64x64xf32> to vector<64xf32>
    %10 = vector.shape_cast %9 : vector<64xf32> to vector<64x1xf32>
    %11 = vector.broadcast %10 : vector<64x1xf32> to vector<64x64xf32>
    %12 = arith.subf %8, %11 : vector<64x64xf32>
    %13 = math.exp %12 : vector<64x64xf32>
    %cst_10 = arith.constant dense<0.000000e+00> : vector<64xf32>
    %14 = vector.multi_reduction <add>, %13, %cst_10 [1] : vector<64x64xf32> to vector<64xf32>
    %15 = vector.shape_cast %14 : vector<64xf32> to vector<64x1xf32>
    %16 = tpu.reciprocal %15 {approx = true} : vector<64x1xf32> -> vector<64x1xf32>
    %17 = vector.broadcast %16 : vector<64x1xf32> to vector<64x64xf32>
    %18 = arith.mulf %13, %17 : vector<64x64xf32>
    %cst_11 = arith.constant dense<0.000000e+00> : vector<64x4xf32>
    %19 = tpu.matmul %18, %5, %cst_11 {dimension_numbers = #tpu.dot_dimension_numbers<[1], [0], [0], [1], [0, 0, 1, 1], [], []>} : vector<64x64xf32>, vector<64x4xf32>, vector<64x4xf32> -> vector<64x4xf32>
    %c0_12 = arith.constant 0 : index
    %c0_13 = arith.constant 0 : index
    %c0_14 = arith.constant 0 : index
    %20 = vector.load %arg4[%c0_12, %c0_13, %c0_14] : memref<1x64x4xf32, #tpu.memory_space<vmem>>, vector<1x64x4xf32>
    %21 = vector.shape_cast %20 : vector<1x64x4xf32> to vector<64x4xf32>
    %22 = vector.shape_cast %19 : vector<64x4xf32> to vector<1x64x4xf32>
    tpu.vector_store %arg4[%c0_12, %c0_13, %c0_14], %22 {strides = array<i32>} : memref<1x64x4xf32, #tpu.memory_space<vmem>>, vector<1x64x4xf32>,
    return
  }
  func.func @transform_0(%arg0: i32) -> (i32, i32, i32) {
    %c0_i32 = arith.constant 0 : i32
    %c0_i32_0 = arith.constant 0 : i32
    %c0_i32_1 = arith.constant 0 : i32
    return %arg0, %c0_i32, %c0_i32_0 : i32, i32, i32
  }
  func.func @transform_1(%arg0: i32) -> (i32, i32, i32) {
    %c0_i32 = arith.constant 0 : i32
    %c0_i32_0 = arith.constant 0 : i32
    %c0_i32_1 = arith.constant 0 : i32
    return %arg0, %c0_i32, %c0_i32_0 : i32, i32, i32
  }
  func.func @transform_2(%arg0: i32) -> (i32, i32, i32) {
    %c0_i32 = arith.constant 0 : i32
    %c0_i32_0 = arith.constant 0 : i32
    %c0_i32_1 = arith.constant 0 : i32
    return %arg0, %c0_i32, %c0_i32_0 : i32, i32, i32
  }
  func.func @transform_3(%arg0: i32) -> (i32, i32, i32) {
    %c0_i32 = arith.constant 0 : i32
    %c0_i32_0 = arith.constant 0 : i32
    %c0_i32_1 = arith.constant 0 : i32
    return %arg0, %c0_i32, %c0_i32_0 : i32, i32, i32
  }
}

module attributes {stable_mosaic.version = 11 : i64} {
  func.func @_conv_stats_kernel(%arg0: i32, %arg1: memref<64x16xbf16, #tpu.memory_space<vmem>>, %arg2: memref<16x16xbf16, #tpu.memory_space<vmem>>, %arg3: memref<1x16xf32, #tpu.memory_space<vmem>>, %arg4: memref<64x16xf32, #tpu.memory_space<vmem>>, %arg5: memref<1x16xf32, #tpu.memory_space<vmem>>, %arg6: memref<1x16xf32, #tpu.memory_space<vmem>>) attributes {dimension_semantics = [#tpu.dimension_semantics<arbitrary>], iteration_bounds = array<i64: 2>, scalar_prefetch = 0 : i64, scratch_operands = 0 : i64, tpu.core_type = #tpu.core_type<tc>, window_params = [{transform_indices = @transform_0, window_bounds = array<i64: 64, 16>}, {pipeline_mode = #tpu.pipeline_mode<synchronous>, transform_indices = @transform_1, window_bounds = array<i64: 16, 16>}, {pipeline_mode = #tpu.pipeline_mode<synchronous>, transform_indices = @transform_2, window_bounds = array<i64: 1, 16>}, {transform_indices = @transform_3, window_bounds = array<i64: 64, 16>}, {pipeline_mode = #tpu.pipeline_mode<synchronous>, transform_indices = @transform_4, window_bounds = array<i64: 1, 16>}, {pipeline_mode = #tpu.pipeline_mode<synchronous>, transform_indices = @transform_5, window_bounds = array<i64: 1, 16>}]} {
    %c0_i32 = arith.constant 0 : i32
    %0 = arith.cmpi eq, %arg0, %c0_i32 : i32
    %1 = arith.extui %0 : i1 to i32
    %c0_i32_0 = arith.constant 0 : i32
    %2 = arith.cmpi ne, %1, %c0_i32_0 : i32
    scf.if %2 {
      %cst_18 = arith.constant 0.000000e+00 : f32
      %21 = vector.broadcast %cst_18 : f32 to vector<1x16xf32>
      %c0_19 = arith.constant 0 : index
      %c0_20 = arith.constant 0 : index
      %22 = vector.load %arg5[%c0_19, %c0_20] : memref<1x16xf32, #tpu.memory_space<vmem>>, vector<1x16xf32>
      tpu.vector_store %arg5[%c0_19, %c0_20], %21 {strides = array<i32>} : memref<1x16xf32, #tpu.memory_space<vmem>>, vector<1x16xf32>,
      %cst_21 = arith.constant 0.000000e+00 : f32
      %23 = vector.broadcast %cst_21 : f32 to vector<1x16xf32>
      %c0_22 = arith.constant 0 : index
      %c0_23 = arith.constant 0 : index
      %24 = vector.load %arg6[%c0_22, %c0_23] : memref<1x16xf32, #tpu.memory_space<vmem>>, vector<1x16xf32>
      tpu.vector_store %arg6[%c0_22, %c0_23], %23 {strides = array<i32>} : memref<1x16xf32, #tpu.memory_space<vmem>>, vector<1x16xf32>,
    } else {
    }
    %c0 = arith.constant 0 : index
    %c0_1 = arith.constant 0 : index
    %3 = vector.load %arg1[%c0, %c0_1] : memref<64x16xbf16, #tpu.memory_space<vmem>>, vector<64x16xbf16>
    %c0_2 = arith.constant 0 : index
    %c0_3 = arith.constant 0 : index
    %4 = vector.load %arg2[%c0_2, %c0_3] : memref<16x16xbf16, #tpu.memory_space<vmem>>, vector<16x16xbf16>
    %cst = arith.constant dense<0.000000e+00> : vector<64x16xf32>
    %5 = tpu.matmul %3, %4, %cst {dimension_numbers = #tpu.dot_dimension_numbers<[1], [0], [0], [1], [0, 0, 1, 1], [], []>} : vector<64x16xbf16>, vector<16x16xbf16>, vector<64x16xf32> -> vector<64x16xf32>
    %c0_4 = arith.constant 0 : index
    %c0_5 = arith.constant 0 : index
    %6 = vector.load %arg3[%c0_4, %c0_5] : memref<1x16xf32, #tpu.memory_space<vmem>>, vector<1x16xf32>
    %7 = vector.broadcast %6 : vector<1x16xf32> to vector<64x16xf32>
    %8 = arith.addf %5, %7 : vector<64x16xf32>
    %c0_6 = arith.constant 0 : index
    %c0_7 = arith.constant 0 : index
    %9 = vector.load %arg4[%c0_6, %c0_7] : memref<64x16xf32, #tpu.memory_space<vmem>>, vector<64x16xf32>
    tpu.vector_store %arg4[%c0_6, %c0_7], %8 {strides = array<i32>} : memref<64x16xf32, #tpu.memory_space<vmem>>, vector<64x16xf32>,
    %c0_8 = arith.constant 0 : index
    %c0_9 = arith.constant 0 : index
    %10 = vector.load %arg5[%c0_8, %c0_9] : memref<1x16xf32, #tpu.memory_space<vmem>>, vector<1x16xf32>
    %cst_10 = arith.constant dense<0.000000e+00> : vector<16xf32>
    %11 = vector.multi_reduction <add>, %8, %cst_10 [0] : vector<64x16xf32> to vector<16xf32>
    %12 = vector.shape_cast %11 : vector<16xf32> to vector<1x16xf32>
    %13 = arith.addf %10, %12 : vector<1x16xf32>
    %c0_11 = arith.constant 0 : index
    %c0_12 = arith.constant 0 : index
    %14 = vector.load %arg5[%c0_11, %c0_12] : memref<1x16xf32, #tpu.memory_space<vmem>>, vector<1x16xf32>
    tpu.vector_store %arg5[%c0_11, %c0_12], %13 {strides = array<i32>} : memref<1x16xf32, #tpu.memory_space<vmem>>, vector<1x16xf32>,
    %c0_13 = arith.constant 0 : index
    %c0_14 = arith.constant 0 : index
    %15 = vector.load %arg6[%c0_13, %c0_14] : memref<1x16xf32, #tpu.memory_space<vmem>>, vector<1x16xf32>
    %16 = arith.mulf %8, %8 : vector<64x16xf32>
    %cst_15 = arith.constant dense<0.000000e+00> : vector<16xf32>
    %17 = vector.multi_reduction <add>, %16, %cst_15 [0] : vector<64x16xf32> to vector<16xf32>
    %18 = vector.shape_cast %17 : vector<16xf32> to vector<1x16xf32>
    %19 = arith.addf %15, %18 : vector<1x16xf32>
    %c0_16 = arith.constant 0 : index
    %c0_17 = arith.constant 0 : index
    %20 = vector.load %arg6[%c0_16, %c0_17] : memref<1x16xf32, #tpu.memory_space<vmem>>, vector<1x16xf32>
    tpu.vector_store %arg6[%c0_16, %c0_17], %19 {strides = array<i32>} : memref<1x16xf32, #tpu.memory_space<vmem>>, vector<1x16xf32>,
    return
  }
  func.func @transform_0(%arg0: i32) -> (i32, i32) {
    %c0_i32 = arith.constant 0 : i32
    %c0_i32_0 = arith.constant 0 : i32
    return %arg0, %c0_i32 : i32, i32
  }
  func.func @transform_1(%arg0: i32) -> (i32, i32) {
    %c0_i32 = arith.constant 0 : i32
    %c0_i32_0 = arith.constant 0 : i32
    %c0_i32_1 = arith.constant 0 : i32
    return %c0_i32, %c0_i32_0 : i32, i32
  }
  func.func @transform_2(%arg0: i32) -> (i32, i32) {
    %c0_i32 = arith.constant 0 : i32
    %c0_i32_0 = arith.constant 0 : i32
    %c0_i32_1 = arith.constant 0 : i32
    return %c0_i32, %c0_i32_0 : i32, i32
  }
  func.func @transform_3(%arg0: i32) -> (i32, i32) {
    %c0_i32 = arith.constant 0 : i32
    %c0_i32_0 = arith.constant 0 : i32
    return %arg0, %c0_i32 : i32, i32
  }
  func.func @transform_4(%arg0: i32) -> (i32, i32) {
    %c0_i32 = arith.constant 0 : i32
    %c0_i32_0 = arith.constant 0 : i32
    %c0_i32_1 = arith.constant 0 : i32
    return %c0_i32, %c0_i32_0 : i32, i32
  }
  func.func @transform_5(%arg0: i32) -> (i32, i32) {
    %c0_i32 = arith.constant 0 : i32
    %c0_i32_0 = arith.constant 0 : i32
    %c0_i32_1 = arith.constant 0 : i32
    return %c0_i32, %c0_i32_0 : i32, i32
  }
}

module attributes {stable_mosaic.version = 11 : i64} {
  func.func @_bn_act_matmul_kernel(%arg0: i32, %arg1: memref<64x16xf32, #tpu.memory_space<vmem>>, %arg2: memref<1x16xf32, #tpu.memory_space<vmem>>, %arg3: memref<1x16xf32, #tpu.memory_space<vmem>>, %arg4: memref<16x64xbf16, #tpu.memory_space<vmem>>, %arg5: memref<1x64xf32, #tpu.memory_space<vmem>>, %arg6: memref<64x64xf32, #tpu.memory_space<vmem>>, %arg7: memref<64x64xf32, #tpu.memory_space<vmem>>) attributes {dimension_semantics = [#tpu.dimension_semantics<parallel>], iteration_bounds = array<i64: 2>, scalar_prefetch = 0 : i64, scratch_operands = 0 : i64, tpu.core_type = #tpu.core_type<tc>, window_params = [{transform_indices = @transform_0, window_bounds = array<i64: 64, 16>}, {pipeline_mode = #tpu.pipeline_mode<synchronous>, transform_indices = @transform_1, window_bounds = array<i64: 1, 16>}, {pipeline_mode = #tpu.pipeline_mode<synchronous>, transform_indices = @transform_2, window_bounds = array<i64: 1, 16>}, {pipeline_mode = #tpu.pipeline_mode<synchronous>, transform_indices = @transform_3, window_bounds = array<i64: 16, 64>}, {pipeline_mode = #tpu.pipeline_mode<synchronous>, transform_indices = @transform_4, window_bounds = array<i64: 1, 64>}, {transform_indices = @transform_5, window_bounds = array<i64: 64, 64>}, {transform_indices = @transform_6, window_bounds = array<i64: 64, 64>}]} {
    %c0 = arith.constant 0 : index
    %c0_0 = arith.constant 0 : index
    %0 = vector.load %arg1[%c0, %c0_0] : memref<64x16xf32, #tpu.memory_space<vmem>>, vector<64x16xf32>
    %c0_1 = arith.constant 0 : index
    %c0_2 = arith.constant 0 : index
    %1 = vector.load %arg2[%c0_1, %c0_2] : memref<1x16xf32, #tpu.memory_space<vmem>>, vector<1x16xf32>
    %2 = vector.broadcast %1 : vector<1x16xf32> to vector<64x16xf32>
    %3 = arith.mulf %0, %2 : vector<64x16xf32>
    %c0_3 = arith.constant 0 : index
    %c0_4 = arith.constant 0 : index
    %4 = vector.load %arg3[%c0_3, %c0_4] : memref<1x16xf32, #tpu.memory_space<vmem>>, vector<1x16xf32>
    %5 = vector.broadcast %4 : vector<1x16xf32> to vector<64x16xf32>
    %6 = arith.addf %3, %5 : vector<64x16xf32>
    %cst = arith.constant 0.000000e+00 : f32
    %7 = vector.broadcast %cst : f32 to vector<64x16xf32>
    %8 = arith.subf %7, %6 : vector<64x16xf32>
    %9 = math.exp %8 : vector<64x16xf32>
    %cst_5 = arith.constant 1.000000e+00 : f32
    %10 = vector.broadcast %cst_5 : f32 to vector<64x16xf32>
    %11 = arith.addf %10, %9 : vector<64x16xf32>
    %12 = tpu.reciprocal %11 {approx = true} : vector<64x16xf32> -> vector<64x16xf32>
    %13 = arith.truncf %12 : vector<64x16xf32> to vector<64x16xbf16>
    %c0_6 = arith.constant 0 : index
    %c0_7 = arith.constant 0 : index
    %14 = vector.load %arg4[%c0_6, %c0_7] : memref<16x64xbf16, #tpu.memory_space<vmem>>, vector<16x64xbf16>
    %cst_8 = arith.constant dense<0.000000e+00> : vector<64x64xf32>
    %15 = tpu.matmul %13, %14, %cst_8 {dimension_numbers = #tpu.dot_dimension_numbers<[1], [0], [0], [1], [0, 0, 1, 1], [], []>} : vector<64x16xbf16>, vector<16x64xbf16>, vector<64x64xf32> -> vector<64x64xf32>
    %c0_9 = arith.constant 0 : index
    %c0_10 = arith.constant 0 : index
    %16 = vector.load %arg5[%c0_9, %c0_10] : memref<1x64xf32, #tpu.memory_space<vmem>>, vector<1x64xf32>
    %17 = vector.broadcast %16 : vector<1x64xf32> to vector<64x64xf32>
    %18 = arith.addf %15, %17 : vector<64x64xf32>
    %c0_11 = arith.constant 0 : index
    %c0_12 = arith.constant 0 : index
    %19 = vector.load %arg6[%c0_11, %c0_12] : memref<64x64xf32, #tpu.memory_space<vmem>>, vector<64x64xf32>
    %20 = arith.mulf %18, %19 : vector<64x64xf32>
    %c0_13 = arith.constant 0 : index
    %c0_14 = arith.constant 0 : index
    %21 = vector.load %arg7[%c0_13, %c0_14] : memref<64x64xf32, #tpu.memory_space<vmem>>, vector<64x64xf32>
    tpu.vector_store %arg7[%c0_13, %c0_14], %20 {strides = array<i32>} : memref<64x64xf32, #tpu.memory_space<vmem>>, vector<64x64xf32>,
    return
  }
  func.func @transform_0(%arg0: i32) -> (i32, i32) {
    %c0_i32 = arith.constant 0 : i32
    %c0_i32_0 = arith.constant 0 : i32
    return %arg0, %c0_i32 : i32, i32
  }
  func.func @transform_1(%arg0: i32) -> (i32, i32) {
    %c0_i32 = arith.constant 0 : i32
    %c0_i32_0 = arith.constant 0 : i32
    %c0_i32_1 = arith.constant 0 : i32
    return %c0_i32, %c0_i32_0 : i32, i32
  }
  func.func @transform_2(%arg0: i32) -> (i32, i32) {
    %c0_i32 = arith.constant 0 : i32
    %c0_i32_0 = arith.constant 0 : i32
    %c0_i32_1 = arith.constant 0 : i32
    return %c0_i32, %c0_i32_0 : i32, i32
  }
  func.func @transform_3(%arg0: i32) -> (i32, i32) {
    %c0_i32 = arith.constant 0 : i32
    %c0_i32_0 = arith.constant 0 : i32
    %c0_i32_1 = arith.constant 0 : i32
    return %c0_i32, %c0_i32_0 : i32, i32
  }
  func.func @transform_4(%arg0: i32) -> (i32, i32) {
    %c0_i32 = arith.constant 0 : i32
    %c0_i32_0 = arith.constant 0 : i32
    %c0_i32_1 = arith.constant 0 : i32
    return %c0_i32, %c0_i32_0 : i32, i32
  }
  func.func @transform_5(%arg0: i32) -> (i32, i32) {
    %c0_i32 = arith.constant 0 : i32
    %c0_i32_0 = arith.constant 0 : i32
    return %arg0, %c0_i32 : i32, i32
  }
  func.func @transform_6(%arg0: i32) -> (i32, i32) {
    %c0_i32 = arith.constant 0 : i32
    %c0_i32_0 = arith.constant 0 : i32
    return %arg0, %c0_i32 : i32, i32
  }
}

</mosaic_0001>

<bundles_post_ra>
// kernel: mhca_block_forward.5
= control target key start
LH: loop header
LB: loop body
LE: loop exit
PB: predicated region body
PF: predicated region fallthrough
CT: control target
= control target key end

     0   :  { %s608_s18 = smov 0   ;;  %s693_s0 = inlined_call_operand.vmem [shape: bf16[128,48], index: 0, kind: input, shape index: {}]   ;;  %s694_s1 = inlined_call_operand.vmem [shape: bf16[48,32], index: 1, kind: input, shape index: {}]   ;;  %s695_s2 = inlined_call_operand.vmem [shape: f32[1,32], index: 2, kind: input, shape index: {}]   ;;  %s696_s3 = inlined_call_operand.vmem [shape: f32[128,32], index: 3, kind: output, shape index: {0}]   ;;  %s697_s4 = inlined_call_operand.vmem [shape: f32[1,32], index: 4, kind: output, shape index: {1}]   ;;  %s698_s5 = inlined_call_operand.vmem [shape: f32[1,32], index: 5, kind: output, shape index: {2}]  }
   0x1 LB: > { %s502_s19 = sadd.s32 4294967295, %s575_s18   ;;  %p506_p0 = scmp.ge.s32.totalorder %s575_s18, 1  ;;  %s575_s18 = sphi %s608_s18, %s16_s18  }
   0x2   : > { %p183_p1 = scmp.lt.s32.totalorder %s575_s18, 3 }
   0x4   : > { %p184_p2 = pnand %p506_p0, %p183_p1 }
   0x5   : > { %s507_s20 = sshll.u32 (!%p184_p2), %s502_s19, 3  ;;  %p511_p4 = scmp.ne.s32.totalorder (!%p184_p2), %s502_s19, 0 }
   0x6   : > { %187 = sbr.rel (%p184_p2) target bundleno = 282 (0x11a), region = 32  ;;  %p212_p3 = scmp.lt.s32.totalorder (!%p184_p2), %s507_s20, 15 }
   0xd   : > { %s700_s20 = smov (!%p212_p3, %s507_s20), 15  ;;  %227 = sbr.rel (%p511_p4) target bundleno = 20 (0x14), region = 36 }
   0xe   : > { %s508_s21 = sshll.u32 %s700_s20, 2  ;;  %s510_s22 = sshll.u32 %s700_s20, 3  ;;  %vm228_vm0 = vcmask (!%p511_p4), 253952   ;;  %v577_v0 = vmov (!%p511_p4), 0.0  }
   0xf   : > { %s215_s25 = scalar_lea.vmem %s693_s0, %s508_s21  ;;  %s622_s28 = scalar_lea.vmem %s696_s3, %s510_s22  ;;  %229 = vst.msk [vmem:[%s697_s4] sm:$0x1] (!%p511_p4), %vm228_vm0, %v577_v0  ;;  %230 = vst.msk [vmem:[%s698_s5] sm:$0x1] (!%p511_p4), %vm228_vm0, %v577_v0 }
  0x14 PF: > { %v562_v1 = vld [vmem:[%s694_s1] sm:$0xff]   ;;  %v563_v2 = vld [vmem:[%s694_s1 + $0x8] sm:$0xff]   ;;  %vm290_vm1 = vcmask 392192   ;;  %v564_v4 = vld [vmem:[%s694_s1 + $0x10] sm:$0xff]   ;;  %vm368_vm2 = vcmask 261120   ;;  %vm400_vm3 = vcmask 253952  }
  0x15   : > { %533 = vmatprep.subr.bf16.mxu0 %v562_v1  ;;  %547 = vmatprep.subr.bf16.mxu1 %v562_v1  ;;  %v565_v3 = vld [vmem:[%s215_s25] sm:$0xff]   ;;  %v567_v5 = vld [vmem:[%s215_s25 + $0x10] sm:$0xff]   ;;  %v566_v6 = vld [vmem:[%s215_s25 + $0x8] sm:$0xff]  }
  0x16   : > { %534 = vmatpush3.bf16.msra.mxu0 %v562_v1  ;;  %550 = vmatpush3.bf16.msra.mxu1 %v562_v1  ;;  %v568_v7 = vld [vmem:[%s215_s25 + $0x18] sm:$0xff]   ;;  %v512_v8 = vld [vmem:[%s695_s2] ss:$0 sm:$0xff] }
  0x17   : > { %535 = vmatprep.subr.bf16.mxu0 %v563_v2  ;;  %548 = vmatprep.subr.bf16.mxu1 %v563_v2 }
  0x18   : > { %539 = vmatprep.mubr.msk.bf16.mxu0 %vm290_vm1, %v565_v3  ;;  %543 = vmatprep.mubr.msk.bf16.mxu1 %vm290_vm1, %v567_v5 }
  0x1a   : > { %536 = vmatpush3.bf16.msra.mxu0 %v563_v2  ;;  %551 = vmatpush3.bf16.msra.mxu1 %v563_v2 }
  0x1b   : > { %537 = vmatprep.subr.bf16.mxu0 %v564_v4  ;;  %549 = vmatprep.subr.bf16.mxu1 %v564_v4 }
  0x1e   : > { %538 = vmatpush3.bf16.msra.mxu0 %v564_v4  ;;  %552 = vmatpush3.bf16.msra.mxu1 %v564_v4 }
  0x21   : > { %540 = vmatmul.mubr.msk.bf16.vlgmr.msra.gmra.mrb[0].mxu0 %vm290_vm1, %v566_v6  ;;  %544 = vmatmul.mubr.msk.bf16.vlgmr.msra.gmra.mrb[0].mxu1 %vm290_vm1, %v568_v7 }
  0xf4   : > { %v541_v9 = vpop.f32.mrb[0].mxu0  ;;  %v545_v10 = vpop.f32.mrb[0].mxu1 }
  0xf5   : > { %v346_v11 = vadd.f32 %v541_v9, %v512_v8  ;;  %v337_v12 = vpop.f32.mrb[1].mxu0  ;;  %v362_v13 = vadd.f32 %v545_v10, %v512_v8  ;;  %v353_v14 = vpop.f32.mrb[1].mxu1 }
  0xf6   : > { %v338_v15 = vadd.f32 %v512_v8, %v337_v12  ;;  %v542_v16 = vpop.f32.mrb[2].mxu0  ;;  %v354_v17 = vadd.f32 %v512_v8, %v353_v14  ;;  %v546_v18 = vpop.f32.mrb[2].mxu1 }
  0xf7   : > { %371 = vst.msk [vmem:[%s622_s28 + $0x10] sm:$0xff] %vm368_vm2, %v346_v11  ;;  %v349_v19 = vadd.f32 %v542_v16, %v512_v8  ;;  %v340_v20 = vpop.f32.mrb[3].mxu0  ;;  %375 = vst.msk [vmem:[%s622_s28 + $0x30] sm:$0xff] %vm368_vm2, %v362_v13  ;;  %v356_v21 = vpop.f32.mrb[3].mxu1  ;;  %v405_v24 = vmul.f32 %v346_v11, %v346_v11  ;;  %v381_v28 = vsel %vm368_vm2, %v346_v11, 0.0  ;;  %v365_v31 = vadd.f32 %v546_v18, %v512_v8 }
  0xf8   : > { %369 = vst.msk [vmem:[%s622_s28] sm:$0xff] %vm368_vm2, %v338_v15  ;;  %v403_v22 = vmul.f32 %v338_v15, %v338_v15  ;;  %v341_v23 = vadd.f32 %v512_v8, %v340_v20  ;;  %373 = vst.msk [vmem:[%s622_s28 + $0x20] sm:$0xff] %vm368_vm2, %v354_v17  ;;  %v378_v25 = vsel %vm368_vm2, %v338_v15, 0.0  ;;  %v407_v34 = vmul.f32 %v354_v17, %v354_v17  ;;  %v402_v11 = vld [vmem:[%s698_s5] sm:$0x1] }
  0xf9   : > { %372 = vst.msk [vmem:[%s622_s28 + $0x18] sm:$0xff] %vm368_vm2, %v349_v19  ;;  %v406_v29 = vmul.f32 %v349_v19, %v349_v19  ;;  %v357_v35 = vadd.f32 %v512_v8, %v356_v21  ;;  %376 = vst.msk [vmem:[%s622_s28 + $0x38] sm:$0xff] %vm368_vm2, %v365_v31  ;;  %v414_v38 = vsel %vm368_vm2, %v405_v24, 0.0  ;;  %v383_v39 = vsel %vm368_vm2, %v349_v19, 0.0  ;;  %v377_v8 = vld [vmem:[%s697_s4] sm:$0x1] }
  0xfa   : > { %370 = vst.msk [vmem:[%s622_s28 + $0x8] sm:$0xff] %vm368_vm2, %v341_v23  ;;  %v379_v26 = vsel %vm368_vm2, %v341_v23, 0.0  ;;  %v404_v27 = vmul.f32 %v341_v23, %v341_v23  ;;  %v411_v32 = vsel %vm368_vm2, %v403_v22, 0.0  ;;  %v385_v40 = vsel %vm368_vm2, %v354_v17, 0.0 }
  0xfb   : > { %v380_v30 = vadd.f32 %v379_v26, %v378_v25  ;;  %374 = vst.msk [vmem:[%s622_s28 + $0x28] sm:$0xff] %vm368_vm2, %v357_v35  ;;  %v416_v43 = vsel %vm368_vm2, %v406_v29, 0.0  ;;  %v418_v44 = vsel %vm368_vm2, %v407_v34, 0.0  ;;  %v408_v45 = vmul.f32 %v357_v35, %v357_v35 }
  0xfc   : > { %v412_v33 = vsel %vm368_vm2, %v404_v27, 0.0  ;;  %v409_v48 = vmul.f32 %v362_v13, %v362_v13  ;;  %v387_v49 = vsel %vm368_vm2, %v357_v35, 0.0  ;;  %v389_v52 = vsel %vm368_vm2, %v362_v13, 0.0 }
  0xfd   : > { %v382_v36 = vadd.f32 %v381_v28, %v380_v30  ;;  %v413_v37 = vadd.f32 %v412_v33, %v411_v32  ;;  %v410_v53 = vmul.f32 %v365_v31, %v365_v31  ;;  %v420_v54 = vsel %vm368_vm2, %v408_v45, 0.0 }
  0xfe   : > { %v422_v57 = vsel %vm368_vm2, %v409_v48, 0.0  ;;  %v391_v58 = vsel %vm368_vm2, %v365_v31, 0.0 }
  0xff   : > { %v415_v41 = vadd.f32 %v414_v38, %v413_v37  ;;  %v384_v42 = vadd.f32 %v383_v39, %v382_v36  ;;  %v424_v61 = vsel %vm368_vm2, %v410_v53, 0.0 }
 0x101   : > { %v386_v46 = vadd.f32 %v385_v40, %v384_v42  ;;  %v417_v47 = vadd.f32 %v416_v43, %v415_v41 }
 0x103   : > { %v419_v50 = vadd.f32 %v418_v44, %v417_v47  ;;  %v388_v51 = vadd.f32 %v387_v49, %v386_v46 }
 0x105   : > { %v390_v55 = vadd.f32 %v389_v52, %v388_v51  ;;  %v421_v56 = vadd.f32 %v420_v54, %v419_v50 }
 0x107   : > { %v392_v59 = vadd.f32 %v391_v58, %v390_v55  ;;  %v423_v60 = vadd.f32 %v422_v57, %v421_v56 }
 0x109   : > { %v393_v62 = vrot.slane %v392_v59, 4  ;;  %v425_v63 = vadd.f32 %v424_v61, %v423_v60 }
 0x10b   : > { %v394_v0 = vadd.f32 %v393_v62, %v392_v59  ;;  %v426_v1 = vrot.slane %v425_v63, 4 }
 0x10d   : > { %v395_v2 = vrot.slane %v394_v0, 2  ;;  %v427_v3 = vadd.f32 %v426_v1, %v425_v63 }
 0x10f   : > { %v396_v4 = vadd.f32 %v395_v2, %v394_v0  ;;  %v428_v5 = vrot.slane %v427_v3, 2 }
 0x111   : > { %v397_v6 = vrot.slane %v396_v4, 1  ;;  %v429_v7 = vadd.f32 %v428_v5, %v427_v3 }
 0x113   : > { %v398_v9 = vadd.f32 %v397_v6, %v396_v4  ;;  %v430_v10 = vrot.slane %v429_v7, 1 }
 0x115   : > { %v399_v12 = vadd.f32 %v398_v9, %v377_v8  ;;  %v431_v13 = vadd.f32 %v430_v10, %v429_v7 }
 0x117   : > { %401 = vst.msk [vmem:[%s697_s4] sm:$0x1] %vm400_vm3, %v399_v12  ;;  %v432_v14 = vadd.f32 %v431_v13, %v402_v11 }
 0x119   : > { %433 = vst.msk [vmem:[%s698_s5] sm:$0x1] %vm400_vm3, %v432_v14 }
 0x11a PF: > { %s16_s18 = sadd.s32 1, %s575_s18  }
 0x11b   : > { %p13_p5 = scmp.ge.s32.totalorder %s16_s18, 4  }
 0x11d   :  { %15 = sbr.rel (!%p13_p5) target bundleno = 1 (0x1), region = 82 }

// kernel: mhca_block_forward.6
= control target key start
LH: loop header
LB: loop body
LE: loop exit
PB: predicated region body
PF: predicated region fallthrough
CT: control target
= control target key end

     0   :  { %s551_s18 = smov 0   ;;  %s602_s0 = inlined_call_operand.vmem [shape: f32[128,32], index: 0, kind: input, shape index: {}]   ;;  %s603_s1 = inlined_call_operand.vmem [shape: f32[1,32], index: 1, kind: input, shape index: {}]   ;;  %s604_s2 = inlined_call_operand.vmem [shape: f32[1,32], index: 2, kind: input, shape index: {}]   ;;  %s605_s3 = inlined_call_operand.vmem [shape: bf16[32,48], index: 3, kind: input, shape index: {}]   ;;  %s606_s4 = inlined_call_operand.vmem [shape: f32[1,48], index: 4, kind: input, shape index: {}]   ;;  %s607_s5 = inlined_call_operand.vmem [shape: f32[128,48], index: 5, kind: output, shape index: {}]  }
   0x1 LB: > { %s461_s19 = sadd.s32 4294967295, %s519_s18   ;;  %p465_p0 = scmp.ge.s32.totalorder %s519_s18, 1  ;;  %s519_s18 = sphi %s551_s18, %s15_s18  }
   0x2   : > { %p188_p1 = scmp.lt.s32.totalorder %s519_s18, 3 }
   0x4   : > { %p189_p2 = pnand %p465_p0, %p188_p1 }
   0x5   : > { %v511_v0 = vld [vmem:[%s605_s3] sm:$0xff] (!%p189_p2)   ;;  %s466_s22 = sshll.u32 (!%p189_p2), %s461_s19, 3  ;;  %v512_v1 = vld [vmem:[%s605_s3 + $0x8] sm:$0xff] (!%p189_p2)   ;;  %vm318_vm0 = vcmask (!%p189_p2), 261120   ;;  %vm396_vm9 = vcmask (!%p189_p2), 392192  }
   0x6   : > { %192 = sbr.rel (%p189_p2) target bundleno = 251 (0xfb), region = 40  ;;  %p217_p3 = scmp.lt.s32.totalorder (!%p189_p2), %s466_s22, 15  ;;  %487 = vmatprep.subr.bf16.mxu0 (!%p189_p2), %v511_v0  ;;  %499 = vmatprep.subr.bf16.mxu1 (!%p189_p2), %v511_v0  ;;  %v470_v2 = vld [vmem:[%s603_s1] ss:$0 sm:$0xff] (!%p189_p2) }
   0x7   : > { %488 = vmatpush3.bf16.msra.mxu0 (!%p189_p2), %v511_v0  ;;  %501 = vmatpush3.bf16.msra.mxu1 (!%p189_p2), %v511_v0  ;;  %v471_v3 = vld [vmem:[%s604_s2] ss:$0 sm:$0xff] (!%p189_p2) }
   0x8   : > { %489 = vmatprep.subr.bf16.mxu0 (!%p189_p2), %v512_v1  ;;  %500 = vmatprep.subr.bf16.mxu1 (!%p189_p2), %v512_v1  ;;  %v472_v48 = vld [vmem:[%s606_s4] ss:$0 sm:$0xff] (!%p189_p2) }
   0xb   : > { %490 = vmatpush3.bf16.msra.mxu0 (!%p189_p2), %v512_v1  ;;  %502 = vmatpush3.bf16.msra.mxu1 (!%p189_p2), %v512_v1 }
   0xd   : > { %s609_s22 = smov (!%p217_p3, %s466_s22), 15 }
   0xe   : > { %s467_s25 = sshll.u32 %s609_s22, 3 }
   0xf   : > { %s220_s30 = scalar_lea.vmem %s602_s0, %s467_s25  ;;  %s226_s12 = scalar_lea.vmem %s607_s5, %s467_s25 }
  0x10   : > { %v229_v4 = vld [vmem:[%s220_s30] sm:$0xff]  ;;  %v230_v5 = vld [vmem:[%s220_s30 + $0x8] sm:$0xff]  ;;  %v231_v11 = vld [vmem:[%s220_s30 + $0x10] sm:$0xff] }
  0x11   : > { %v233_v6 = vld [vmem:[%s220_s30 + $0x20] sm:$0xff]  ;;  %v244_v7 = vmul.f32 %v470_v2, %v229_v4  ;;  %v245_v8 = vmul.f32 %v470_v2, %v230_v5  ;;  %v234_v9 = vld [vmem:[%s220_s30 + $0x28] sm:$0xff]  ;;  %v232_v12 = vld [vmem:[%s220_s30 + $0x18] sm:$0xff]  ;;  %v246_v14 = vmul.f32 %v470_v2, %v231_v11 }
  0x12   : > { %v248_v10 = vmul.f32 %v470_v2, %v233_v6  ;;  %v249_v13 = vmul.f32 %v470_v2, %v234_v9  ;;  %v247_v15 = vmul.f32 %v470_v2, %v232_v12  ;;  %v235_v16 = vld [vmem:[%s220_s30 + $0x30] sm:$0xff]  ;;  %v236_v17 = vld [vmem:[%s220_s30 + $0x38] sm:$0xff] }
  0x13   : > { %v259_v18 = vadd.f32 %v471_v3, %v244_v7  ;;  %v260_v19 = vadd.f32 %v471_v3, %v245_v8  ;;  %v250_v21 = vmul.f32 %v470_v2, %v235_v16  ;;  %v261_v23 = vadd.f32 %v471_v3, %v246_v14 }
  0x14   : > { %v263_v20 = vadd.f32 %v471_v3, %v248_v10  ;;  %v264_v22 = vadd.f32 %v471_v3, %v249_v13  ;;  %v262_v24 = vadd.f32 %v471_v3, %v247_v15  ;;  %v251_v25 = vmul.f32 %v470_v2, %v236_v17 }
  0x15   : > { %vm267_vm1 = vcmp.ge.f32.partialorder %v259_v18, 0.0  ;;  %vm268_vm2 = vcmp.ge.f32.partialorder %v260_v19, 0.0  ;;  %v275_v26 = vmul.f32 0.2, %v259_v18  ;;  %v276_v27 = vmul.f32 0.2, %v260_v19 }
  0x16   : > { %vm271_vm3 = vcmp.ge.f32.partialorder %v263_v20, 0.0  ;;  %vm272_vm4 = vcmp.ge.f32.partialorder %v264_v22, 0.0  ;;  %v279_v28 = vmul.f32 0.2, %v263_v20  ;;  %v280_v29 = vmul.f32 0.2, %v264_v22 }
  0x17   : > { %v283_v30 = vsel %vm267_vm1, %v259_v18, %v275_v26  ;;  %v284_v31 = vsel %vm268_vm2, %v260_v19, %v276_v27  ;;  %vm269_vm5 = vcmp.ge.f32.partialorder %v261_v23, 0.0  ;;  %vm270_vm6 = vcmp.ge.f32.partialorder %v262_v24, 0.0 }
  0x18   : > { %v291_v32 = vpack.c.bf16 %v284_v31, %v283_v30  ;;  %v287_v33 = vsel %vm271_vm3, %v263_v20, %v279_v28  ;;  %v288_v34 = vsel %vm272_vm4, %v264_v22, %v280_v29  ;;  %v277_v35 = vmul.f32 0.2, %v261_v23 }
  0x19   : > { %v293_v36 = vpack.c.bf16 %v288_v34, %v287_v33  ;;  %v278_v37 = vmul.f32 0.2, %v262_v24  ;;  %v265_v38 = vadd.f32 %v471_v3, %v250_v21  ;;  %v266_v39 = vadd.f32 %v471_v3, %v251_v25 }
  0x1a   : > { %491 = vmatprep.mubr.msk.bf16.mxu0 %vm318_vm0, %v291_v32  ;;  %v285_v40 = vsel %vm269_vm5, %v261_v23, %v277_v35 }
  0x1b   : > { %495 = vmatprep.mubr.msk.bf16.mxu1 %vm318_vm0, %v293_v36  ;;  %v286_v41 = vsel %vm270_vm6, %v262_v24, %v278_v37  ;;  %vm273_vm7 = vcmp.ge.f32.partialorder %v265_v38, 0.0  ;;  %vm274_vm8 = vcmp.ge.f32.partialorder %v266_v39, 0.0  ;;  %v281_v42 = vmul.f32 0.2, %v265_v38 }
  0x1c   : > { %v292_v43 = vpack.c.bf16 %v286_v41, %v285_v40  ;;  %v282_v44 = vmul.f32 0.2, %v266_v39 }
  0x1d   : > { %v289_v45 = vsel %vm273_vm7, %v265_v38, %v281_v42 }
  0x1e   : > { %492 = vmatmul.mubr.msk.bf16.vlgmr.msra.gmra.mrb[0].mxu0 %vm318_vm0, %v292_v43  ;;  %v290_v46 = vsel %vm274_vm8, %v266_v39, %v282_v44 }
  0x1f   : > { %v294_v47 = vpack.c.bf16 %v290_v46, %v289_v45 }
  0x21   : > { %496 = vmatmul.mubr.msk.bf16.vlgmr.msra.gmra.mrb[0].mxu1 %vm318_vm0, %v294_v47 }
  0xf1   : > { %v493_v49 = vpop.f32.mrb[0].mxu0 }
  0xf2   : > { %v374_v50 = vadd.f32 %v493_v49, %v472_v48  ;;  %v365_v51 = vpop.f32.mrb[1].mxu0 }
  0xf3   : > { %v366_v52 = vadd.f32 %v472_v48, %v365_v51  ;;  %v494_v53 = vpop.f32.mrb[2].mxu0 }
  0xf4   : > { %399 = vst.msk [vmem:[%s226_s12 + $0x10] sm:$0xff] %vm396_vm9, %v374_v50  ;;  %v497_v54 = vpop.f32.mrb[0].mxu1  ;;  %v377_v55 = vadd.f32 %v494_v53, %v472_v48  ;;  %v368_v56 = vpop.f32.mrb[3].mxu0 }
  0xf5   : > { %v390_v57 = vadd.f32 %v497_v54, %v472_v48  ;;  %397 = vst.msk [vmem:[%s226_s12] sm:$0xff] %vm396_vm9, %v366_v52  ;;  %v381_v58 = vpop.f32.mrb[1].mxu1  ;;  %v369_v59 = vadd.f32 %v472_v48, %v368_v56 }
  0xf6   : > { %v382_v60 = vadd.f32 %v472_v48, %v381_v58  ;;  %400 = vst.msk [vmem:[%s226_s12 + $0x18] sm:$0xff] %vm396_vm9, %v377_v55  ;;  %v498_v61 = vpop.f32.mrb[2].mxu1 }
  0xf7   : > { %403 = vst.msk [vmem:[%s226_s12 + $0x30] sm:$0xff] %vm396_vm9, %v390_v57  ;;  %v393_v62 = vadd.f32 %v498_v61, %v472_v48  ;;  %398 = vst.msk [vmem:[%s226_s12 + $0x8] sm:$0xff] %vm396_vm9, %v369_v59  ;;  %v384_v63 = vpop.f32.mrb[3].mxu1 }
  0xf8   : > { %401 = vst.msk [vmem:[%s226_s12 + $0x20] sm:$0xff] %vm396_vm9, %v382_v60  ;;  %v385_v0 = vadd.f32 %v472_v48, %v384_v63 }
  0xf9   : > { %404 = vst.msk [vmem:[%s226_s12 + $0x38] sm:$0xff] %vm396_vm9, %v393_v62 }
  0xfa   : > { %402 = vst.msk [vmem:[%s226_s12 + $0x28] sm:$0xff] %vm396_vm9, %v385_v0 }
  0xfb PF: > { %s15_s18 = sadd.s32 1, %s519_s18  }
  0xfc   : > { %p12_p4 = scmp.ge.s32.totalorder %s15_s18, 4  }
  0xfe   :  { %14 = sbr.rel (!%p12_p4) target bundleno = 1 (0x1), region = 70 }

// kernel: mhca_block_forward.7
= control target key start
LH: loop header
LB: loop body
LE: loop exit
PB: predicated region body
PF: predicated region fallthrough
CT: control target
= control target key end

     0   :  { %s941_s12 = smov 0   ;;  %s1070_s0 = inlined_call_operand.vmem [shape: f32[8,64,4], index: 0, kind: input, shape index: {}]   ;;  %s1071_s1 = inlined_call_operand.vmem [shape: f32[8,64,4], index: 1, kind: input, shape index: {}]   ;;  %s1072_s2 = inlined_call_operand.vmem [shape: f32[8,64,4], index: 2, kind: input, shape index: {}]   ;;  %s1073_s3 = inlined_call_operand.vmem [shape: f32[8,64,4], index: 3, kind: output, shape index: {}]  }
   0x1 LB: > { %s702_s13 = sadd.s32 4294967295, %s919_s12   ;;  %p706_p0 = scmp.ge.s32.totalorder %s919_s12, 1  ;;  %s919_s12 = sphi %s941_s12, %s13_s12  }
   0x2   : > { %p157_p1 = scmp.lt.s32.totalorder %s919_s12, 9 }
   0x4   : > { %p158_p2 = pnand %p706_p0, %p157_p1 }
   0x5   : > { %p191_p3 = scmp.lt.s32.totalorder (!%p158_p2), %s702_s13, 7  ;;  %vm235_vm0 = vcmask (!%p158_p2), 31744   ;;  %vm397_vm2 = vcmask (!%p158_p2), 523264  }
   0x6   : > { %161 = sbr.rel (%p158_p2) target bundleno = 810 (0x32a), region = 32  ;;  %vm957_vm1 = vmpackc.low (!%p158_p2), %vm235_vm0, %vm235_vm0 }
   0xd   : > { %s1077_s13 = smov (!%p191_p3, %s702_s13), 7 }
   0xe   : > { %s949_s14 = sshll.u32 %s1077_s13, 6 }
   0xf   : > { %s200_s17 = scalar_lea.vmem %s1071_s1, %s949_s14  ;;  %s965_s20 = scalar_lea.vmem %s1070_s0, %s949_s14 }
  0x10   : > { %v219_v1 = vld [vmem:[%s200_s17] sm:$0xff]  ;;  %v220_v2 = vld [vmem:[%s200_s17 + $0x8] sm:$0xff]  ;;  %v221_v3 = vld [vmem:[%s200_s17 + $0x10] sm:$0xff]  ;;  %s205_s23 = scalar_lea.vmem %s1072_s2, %s949_s14  ;;  %s210_s26 = scalar_lea.vmem %s1073_s3, %s949_s14 }
  0x11   : > { %v833_v4 = vpack.c.bf16 %v220_v2, %v219_v1  ;;  %v222_v5 = vld [vmem:[%s200_s17 + $0x18] sm:$0xff]  ;;  %v211_v7 = vld [vmem:[%s965_s20] sm:$0xff]  ;;  %v224_v9 = vld [vmem:[%s200_s17 + $0x28] sm:$0xff] }
  0x12   : > { %v839_v6 = vpack.c.bf16 %v222_v5, %v221_v3  ;;  %793 = vmatprep.mubr.msk.f32.mxu0 %vm235_vm0, %v211_v7  ;;  %v223_v8 = vld [vmem:[%s200_s17 + $0x20] sm:$0xff]  ;;  %v225_v11 = vld [vmem:[%s200_s17 + $0x30] sm:$0xff]  ;;  %v226_v12 = vld [vmem:[%s200_s17 + $0x38] sm:$0xff] }
  0x13   : > { %835 = vmatprep.subr.msk.bf16.mxu0 %vm957_vm1, %v833_v4  ;;  %v845_v10 = vpack.c.bf16 %v224_v9, %v223_v8  ;;  %v851_v13 = vpack.c.bf16 %v226_v12, %v225_v11  ;;  %v212_v14 = vld [vmem:[%s965_s20 + $0x8] sm:$0xff]  ;;  %v213_v15 = vld [vmem:[%s965_s20 + $0x10] sm:$0xff]  ;;  %v214_v16 = vld [vmem:[%s965_s20 + $0x18] sm:$0xff] }
  0x14   : > { %838 = vmatpush3.bf16.xpose.msk.msra.mxu0 %vm957_vm1, %v833_v4  ;;  %v215_v17 = vld [vmem:[%s965_s20 + $0x20] sm:$0xff]  ;;  %v216_v18 = vld [vmem:[%s965_s20 + $0x28] sm:$0xff]  ;;  %v217_v19 = vld [vmem:[%s965_s20 + $0x30] sm:$0xff] }
  0x15   : > { %841 = vmatprep.subr.msk.bf16.mxu0 %vm957_vm1, %v839_v6  ;;  %v218_v20 = vld [vmem:[%s965_s20 + $0x38] sm:$0xff] }
  0x1c   : > { %844 = vmatpush3.bf16.xpose.msk.msra.mxu0 %vm957_vm1, %v839_v6 }
  0x1d   : > { %847 = vmatprep.subr.msk.bf16.mxu0 %vm957_vm1, %v845_v10 }
  0x24   : > { %850 = vmatpush3.bf16.xpose.msk.msra.mxu0 %vm957_vm1, %v845_v10 }
  0x25   : > { %853 = vmatprep.subr.msk.bf16.mxu0 %vm957_vm1, %v851_v13 }
  0x2c   : > { %856 = vmatpush3.bf16.xpose.msk.msra.mxu0 %vm957_vm1, %v851_v13 }
  0x33   : > { %794 = vmatmul.mubr.msk.f32.vlgmr.msra.gmra.mrb[0].mxu0 %vm235_vm0, %v212_v14 }
  0x34   : > { %796 = vmatprep.mubr.msk.f32.mxu0 %vm235_vm0, %v213_v15 }
  0x37   : > { %797 = vmatmul.mubr.msk.f32.gmra.mrb[2].mxu0 %vm235_vm0, %v214_v16 }
  0x38   : > { %799 = vmatprep.mubr.msk.f32.mxu0 %vm235_vm0, %v215_v17 }
  0x3b   : > { %800 = vmatmul.mubr.msk.f32.gmra.mrb[4].mxu0 %vm235_vm0, %v216_v18 }
  0x3c   : > { %802 = vmatprep.mubr.msk.f32.mxu0 %vm235_vm0, %v217_v19  ;;  %v227_v19 = vld [vmem:[%s205_s23] sm:$0xff] }
  0x3f   : > { %803 = vmatmul.mubr.msk.f32.gmra.mrb[6].mxu0 %vm235_vm0, %v218_v20  ;;  %v228_v20 = vld [vmem:[%s205_s23 + $0x8] sm:$0xff] }
 0x106   : > { %v795_v21 = vpop.f32.mrb[0].mxu0 }
 0x107   : > { %v350_v22 = vpop.f32.mrb[1].mxu0  ;;  %v390_v24 = vmul.f32 0.5, %v795_v21 }
 0x108   : > { %v389_v23 = vmul.f32 0.5, %v350_v22  ;;  %v857_v22 = vpack.c.bf16 %v228_v20, %v227_v19 }
 0x109   : > { %v401_v31 = vsel %vm397_vm2, %v390_v24, -inf }
 0x10a   : > { %v798_v25 = vpop.f32.mrb[2].mxu0  ;;  %v398_v26 = vsel %vm397_vm2, %v389_v23, -inf  ;;  %858 = vmatprep.subr.bf16.mxu1 %v857_v22 }
 0x10b   : > { %399 = vmax.xlane.f32.xlu0 %v398_v26  ;;  %v360_v27 = vpop.f32.mrb[3].mxu0  ;;  %v392_v29 = vmul.f32 0.5, %v798_v25  ;;  %860 = vmatpush3.bf16.msra.mxu1 %v857_v22  ;;  %v230_v25 = vld [vmem:[%s205_s23 + $0x18] sm:$0xff] }
 0x10c   : > { %v391_v28 = vmul.f32 0.5, %v360_v27  ;;  %v231_v27 = vld [vmem:[%s205_s23 + $0x20] sm:$0xff] }
 0x10d   : > { %v407_v37 = vsel %vm397_vm2, %v392_v29, -inf }
 0x10e   : > { %v801_v30 = vpop.f32.mrb[4].mxu0  ;;  %v404_v32 = vsel %vm397_vm2, %v391_v28, -inf }
 0x10f   : > { %402 = vmax.xlane.f32.xlu0 %v401_v31  ;;  %405 = vmax.xlane.f32.xlu1 %v404_v32  ;;  %v370_v33 = vpop.f32.mrb[5].mxu0  ;;  %v394_v35 = vmul.f32 0.5, %v801_v30  ;;  %v233_v30 = vld [vmem:[%s205_s23 + $0x30] sm:$0xff]  ;;  %v234_v31 = vld [vmem:[%s205_s23 + $0x38] sm:$0xff] }
 0x110   : > { %v393_v34 = vmul.f32 0.5, %v370_v33  ;;  %v869_v32 = vpack.c.bf16 %v234_v31, %v233_v30 }
 0x111   : > { %v413_v42 = vsel %vm397_vm2, %v394_v35, -inf }
 0x112   : > { %v804_v36 = vpop.f32.mrb[6].mxu0  ;;  %v410_v38 = vsel %vm397_vm2, %v393_v34, -inf }
 0x113   : > { %408 = vmax.xlane.f32.xlu1 %v407_v37  ;;  %411 = vmax.xlane.f32.xlu0 %v410_v38  ;;  %v380_v39 = vpop.f32.mrb[7].mxu0  ;;  %v396_v41 = vmul.f32 0.5, %v804_v36 }
 0x114   : > { %v395_v40 = vmul.f32 0.5, %v380_v39 }
 0x115   : > { %v419_v44 = vsel %vm397_vm2, %v396_v41, -inf }
 0x116   : > { %v416_v43 = vsel %vm397_vm2, %v395_v40, -inf }
 0x117   : > { %414 = vmax.xlane.f32.xlu1 %v413_v42  ;;  %417 = vmax.xlane.f32.xlu0 %v416_v43 }
 0x11b   : > { %420 = vmax.xlane.f32.xlu1 %v419_v44 }
 0x198   : > { %v400_v45 = vpop.xlane.xlu0 %399 }
 0x199   : > { %v422_v46 = vsub.f32 %v389_v23, %v400_v45 }
 0x19b   : > { %v430_v47 = vmul.f32 1.442695, %v422_v46 }
 0x19c   : > { %v403_v48 = vpop.xlane.xlu0 %402  ;;  %v406_v49 = vpop.xlane.xlu1 %405 }
 0x19d   : > { %881 = vpow2.f32 %v430_v47  ;;  %v423_v50 = vsub.f32 %v390_v24, %v403_v48  ;;  %v424_v51 = vsub.f32 %v391_v28, %v406_v49  ;;  %v229_v24 = vld [vmem:[%s205_s23 + $0x10] sm:$0xff]  ;;  %v232_v28 = vld [vmem:[%s205_s23 + $0x28] sm:$0xff] }
 0x19e   : > { %v861_v26 = vpack.c.bf16 %v230_v25, %v229_v24 }
 0x19f   : > { %v432_v52 = vmul.f32 1.442695, %v423_v50  ;;  %v434_v53 = vmul.f32 1.442695, %v424_v51 }
 0x1a0   : > { %v409_v54 = vpop.xlane.xlu1 %408  ;;  %v412_v55 = vpop.xlane.xlu0 %411  ;;  %862 = vmatprep.subr.bf16.mxu1 %v861_v26 }
 0x1a1   : > { %883 = vpow2.f32 %v432_v52  ;;  %v425_v56 = vsub.f32 %v392_v29, %v409_v54  ;;  %v426_v57 = vsub.f32 %v393_v34, %v412_v55  ;;  %864 = vmatpush3.bf16.msra.mxu1 %v861_v26  ;;  %v865_v29 = vpack.c.bf16 %v232_v28, %v231_v27 }
 0x1a2   : > { %885 = vpow2.f32 %v434_v53 }
 0x1a3   : > { %v436_v58 = vmul.f32 1.442695, %v425_v56  ;;  %v438_v59 = vmul.f32 1.442695, %v426_v57  ;;  %866 = vmatprep.subr.bf16.mxu1 %v865_v29 }
 0x1a4   : > { %v415_v60 = vpop.xlane.xlu1 %414  ;;  %v418_v61 = vpop.xlane.xlu0 %417 }
 0x1a5   : > { %887 = vpow2.f32 %v436_v58  ;;  %v427_v62 = vsub.f32 %v394_v35, %v415_v60  ;;  %v428_v63 = vsub.f32 %v395_v40, %v418_v61  ;;  %868 = vmatpush3.bf16.msra.mxu1 %v865_v29 }
 0x1a6   : > { %889 = vpow2.f32 %v438_v59  ;;  %870 = vmatprep.subr.bf16.mxu1 %v869_v32 }
 0x1a7   : > { %v1007_v0 = vpop.eup %881  ;;  %v440_v1 = vmul.f32 1.442695, %v427_v62  ;;  %v442_v2 = vmul.f32 1.442695, %v428_v63 }
 0x1a8   : > { %v421_v3 = vpop.xlane.xlu1 %420  ;;  %v446_v4 = vsel %vm397_vm2, %v1007_v0, 0.0 }
 0x1a9   : > { %891 = vpow2.f32 %v440_v1  ;;  %v429_v5 = vsub.f32 %v396_v41, %v421_v3  ;;  %447 = vadd.xlane.f32.xlu0 %v446_v4  ;;  %872 = vmatpush3.bf16.msra.mxu1 %v869_v32 }
 0x1aa   : > { %893 = vpow2.f32 %v442_v2 }
 0x1ab   : > { %v1011_v6 = vpop.eup %883  ;;  %v444_v7 = vmul.f32 1.442695, %v429_v5 }
 0x1ac   : > { %v1013_v8 = vpop.eup %885  ;;  %v449_v9 = vsel %vm397_vm2, %v1011_v6, 0.0 }
 0x1ad   : > { %895 = vpow2.f32 %v444_v7  ;;  %450 = vadd.xlane.f32.xlu1 %v449_v9  ;;  %v452_v10 = vsel %vm397_vm2, %v1013_v8, 0.0 }
 0x1ae   : > { %453 = vadd.xlane.f32.xlu0 %v452_v10 }
 0x1af   : > { %v1019_v11 = vpop.eup %887 }
 0x1b0   : > { %v1021_v12 = vpop.eup %889  ;;  %v455_v13 = vsel %vm397_vm2, %v1019_v11, 0.0 }
 0x1b1   : > { %456 = vadd.xlane.f32.xlu1 %v455_v13  ;;  %v458_v14 = vsel %vm397_vm2, %v1021_v12, 0.0 }
 0x1b2   : > { %459 = vadd.xlane.f32.xlu0 %v458_v14 }
 0x1b3   : > { %v1027_v15 = vpop.eup %891 }
 0x1b4   : > { %v1029_v16 = vpop.eup %893  ;;  %v461_v17 = vsel %vm397_vm2, %v1027_v15, 0.0 }
 0x1b5   : > { %462 = vadd.xlane.f32.xlu1 %v461_v17  ;;  %v464_v18 = vsel %vm397_vm2, %v1029_v16, 0.0 }
 0x1b6   : > { %465 = vadd.xlane.f32.xlu0 %v464_v18 }
 0x1b7   : > { %v896_v21 = vpop.eup %895 }
 0x1b8   : > { %v467_v23 = vsel %vm397_vm2, %v896_v21, 0.0 }
 0x1b9   : > { %468 = vadd.xlane.f32.xlu1 %v467_v23 }
 0x236   : > { %v448_v33 = vpop.xlane.xlu0 %447 }
 0x237   : > { %897 = vrcp.f32 %v448_v33 }
 0x23a   : > { %v451_v34 = vpop.xlane.xlu1 %450 }
 0x23b   : > { %899 = vrcp.f32 %v451_v34  ;;  %v454_v35 = vpop.xlane.xlu0 %453 }
 0x23c   : > { %901 = vrcp.f32 %v454_v35 }
 0x23e   : > { %v457_v36 = vpop.xlane.xlu1 %456 }
 0x23f   : > { %903 = vrcp.f32 %v457_v36  ;;  %v460_v37 = vpop.xlane.xlu0 %459 }
 0x240   : > { %905 = vrcp.f32 %v460_v37 }
 0x241   : > { %v898_v38 = vpop.eup %897 }
 0x242   : > { %v463_v39 = vpop.xlane.xlu1 %462  ;;  %v478_v40 = vmul.f32 %v898_v38, %v1007_v0 }
 0x243   : > { %907 = vrcp.f32 %v463_v39  ;;  %v466_v41 = vpop.xlane.xlu0 %465 }
 0x244   : > { %909 = vrcp.f32 %v466_v41  ;;  %821 = vmatprep.mubr.msk.f32.mxu1 %vm397_vm2, %v478_v40 }
 0x245   : > { %v900_v42 = vpop.eup %899 }
 0x246   : > { %v902_v43 = vpop.eup %901  ;;  %v469_v44 = vpop.xlane.xlu1 %468  ;;  %v479_v45 = vmul.f32 %v900_v42, %v1011_v6 }
 0x247   : > { %911 = vrcp.f32 %v469_v44  ;;  %v480_v46 = vmul.f32 %v902_v43, %v1013_v8 }
 0x248   : > { %822 = vmatmul.mubr.msk.f32.vlgmr.msra.gmra.mrb[0].mxu1 %vm397_vm2, %v479_v45 }
 0x249   : > { %v904_v47 = vpop.eup %903  ;;  %824 = vmatprep.mubr.msk.f32.mxu1 %vm397_vm2, %v480_v46 }
 0x24a   : > { %v906_v48 = vpop.eup %905  ;;  %v481_v49 = vmul.f32 %v904_v47, %v1019_v11 }
 0x24b   : > { %v482_v50 = vmul.f32 %v906_v48, %v1021_v12 }
 0x24c   : > { %825 = vmatmul.mubr.msk.f32.gmra.mrb[2].mxu1 %vm397_vm2, %v481_v49 }
 0x24d   : > { %v908_v51 = vpop.eup %907  ;;  %827 = vmatprep.mubr.msk.f32.mxu1 %vm397_vm2, %v482_v50 }
 0x24e   : > { %v910_v52 = vpop.eup %909  ;;  %v483_v53 = vmul.f32 %v908_v51, %v1027_v15 }
 0x24f   : > { %v484_v54 = vmul.f32 %v910_v52, %v1029_v16 }
 0x250   : > { %828 = vmatmul.mubr.msk.f32.gmra.mrb[4].mxu1 %vm397_vm2, %v483_v53 }
 0x251   : > { %v912_v55 = vpop.eup %911  ;;  %830 = vmatprep.mubr.msk.f32.mxu1 %vm397_vm2, %v484_v54 }
 0x252   : > { %v485_v56 = vmul.f32 %v912_v55, %v896_v21 }
 0x254   : > { %831 = vmatmul.mubr.msk.f32.gmra.mrb[6].mxu1 %vm397_vm2, %v485_v56 }
 0x31b   : > { %v823_v57 = vpop.f32.mrb[0].mxu1 }
 0x31c   : > { %616 = vst.msk [vmem:[%s210_s26 + $0x8] sm:$0xff] %vm235_vm0, %v823_v57  ;;  %v576_v58 = vpop.f32.mrb[1].mxu1 }
 0x31d   : > { %615 = vst.msk [vmem:[%s210_s26] sm:$0xff] %vm235_vm0, %v576_v58 }
 0x31f   : > { %v826_v59 = vpop.f32.mrb[2].mxu1 }
 0x320   : > { %618 = vst.msk [vmem:[%s210_s26 + $0x18] sm:$0xff] %vm235_vm0, %v826_v59  ;;  %v586_v60 = vpop.f32.mrb[3].mxu1 }
 0x321   : > { %617 = vst.msk [vmem:[%s210_s26 + $0x10] sm:$0xff] %vm235_vm0, %v586_v60 }
 0x323   : > { %v829_v61 = vpop.f32.mrb[4].mxu1 }
 0x324   : > { %620 = vst.msk [vmem:[%s210_s26 + $0x28] sm:$0xff] %vm235_vm0, %v829_v61  ;;  %v596_v62 = vpop.f32.mrb[5].mxu1 }
 0x325   : > { %619 = vst.msk [vmem:[%s210_s26 + $0x20] sm:$0xff] %vm235_vm0, %v596_v62 }
 0x327   : > { %v832_v63 = vpop.f32.mrb[6].mxu1 }
 0x328   : > { %622 = vst.msk [vmem:[%s210_s26 + $0x38] sm:$0xff] %vm235_vm0, %v832_v63  ;;  %v606_v0 = vpop.f32.mrb[7].mxu1 }
 0x329   : > { %621 = vst.msk [vmem:[%s210_s26 + $0x30] sm:$0xff] %vm235_vm0, %v606_v0 }
 0x32a PF: > { %s13_s12 = sadd.s32 1, %s919_s12  }
 0x32b   : > { %p10_p4 = scmp.ge.s32.totalorder %s13_s12, 10  }
 0x32d   :  { %12 = sbr.rel (!%p10_p4) target bundleno = 1 (0x1), region = 68 }

// kernel: tile.8
= control target key start
LH: loop header
LB: loop body
LE: loop exit
PB: predicated region body
PF: predicated region fallthrough
CT: control target
= control target key end

     0   :  { %s22_s0 = inlined_call_operand.vmem [shape: f32[16], index: 0, kind: input, shape index: {}]   ;;  %s23_s1 = inlined_call_operand.vmem [shape: f32[4,16], index: 1, kind: output, shape index: {}]  }
   0x1   :  { %v4_v0 = vld [vmem:[%s22_s0] ss:$0 sm:$0xff] }
   0x2   :  { %5 = vst [vmem:[%s23_s1] sm:$0xf] %v4_v0 }

// kernel: tile.9
= control target key start
LH: loop header
LB: loop body
LE: loop exit
PB: predicated region body
PF: predicated region fallthrough
CT: control target
= control target key end

     0   :  { %vm7_vm0 = vcmask 130048   ;;  %s37_s8 = smov 16   ;;  %s38_s9 = smov 32   ;;  %vm13_vm1 = vcmask 523648   ;;  %vm19_vm2 = vcmask 392448   ;;  %vm25_vm3 = vcmask 261248   ;;  %s55_s0 = inlined_call_operand.vmem [shape: f32[4,16], index: 0, kind: input, shape index: {}]   ;;  %s56_s1 = inlined_call_operand.vmem [shape: f32[1,64], index: 1, kind: output, shape index: {}]  }
   0x1   :  { %v4_v0 = vld [vmem:[%s55_s0] sm:$0xf]  ;;  %s36_s0 = smov 48  }
   0x2   :  { %5 = vst [vmem:[#allocation1] sm:$0xf] %v4_v0 }
   0x9   :  { %v10_v1 = vld [vmem:[#allocation1 + $0x3] sm:$0x1]   ;;  %v22_v2 = vld [vmem:[#allocation1 + $0x1] sm:$0x1]   ;;  %v6_v3 = vld [vmem:[#allocation1] sm:$0x1]  }
   0xa   :  { %11 = vrot.lane.b32.xlu0 %v10_v1, %s36_s0  ;;  %23 = vrot.lane.b32.xlu1 %v22_v2, %s37_s8  ;;  %v16_v4 = vld [vmem:[#allocation1 + $0x2] sm:$0x1]   ;;  %8 = vst.msk [vmem:[#allocation0] sm:$0x1] %vm7_vm0, %v6_v3  }
   0xe   :  { %17 = vrot.lane.b32.xlu0 %v16_v4, %s38_s9 }
  0x7c   :  { %v12_v5 = vpop.permute.xlu0 %11   ;;  %v24_v6 = vpop.permute.xlu1 %23  }
  0x7d   :  { %14 = vst.msk [vmem:[#allocation0] sm:$0x1] %vm13_vm1, %v12_v5  }
  0x80   :  { %v18_v7 = vpop.permute.xlu0 %17  }
  0x81   :  { %20 = vst.msk [vmem:[#allocation0] sm:$0x1] %vm19_vm2, %v18_v7  }
  0x82   :  { %26 = vst.msk [vmem:[#allocation0] sm:$0x1] %vm25_vm3, %v24_v6  }
  0x89   :  { %v30_v8 = vld [vmem:[#allocation0] sm:$0x1] }
  0x8a   :  { %32 = vst [vmem:[%s56_s1] sm:$0x1] %v30_v8 }

// kernel: mhca_block_forward.8
= control target key start
LH: loop header
LB: loop body
LE: loop exit
PB: predicated region body
PF: predicated region fallthrough
CT: control target
= control target key end

     0   :  { %s577_s18 = smov 0   ;;  %s656_s0 = inlined_call_operand.vmem [shape: bf16[128,16], index: 0, kind: input, shape index: {}]   ;;  %s657_s1 = inlined_call_operand.vmem [shape: bf16[16,16], index: 1, kind: input, shape index: {}]   ;;  %s658_s2 = inlined_call_operand.vmem [shape: f32[1,16], index: 2, kind: input, shape index: {}]   ;;  %s659_s3 = inlined_call_operand.vmem [shape: f32[128,16], index: 3, kind: output, shape index: {0}]   ;;  %s660_s4 = inlined_call_operand.vmem [shape: f32[1,16], index: 4, kind: output, shape index: {1}]   ;;  %s661_s5 = inlined_call_operand.vmem [shape: f32[1,16], index: 5, kind: output, shape index: {2}]  }
   0x1 LB: > { %s485_s19 = sadd.s32 4294967295, %s544_s18   ;;  %p489_p0 = scmp.ge.s32.totalorder %s544_s18, 1  ;;  %s544_s18 = sphi %s577_s18, %s16_s18  }
   0x2   : > { %p183_p1 = scmp.lt.s32.totalorder %s544_s18, 3 }
   0x4   : > { %p184_p2 = pnand %p489_p0, %p183_p1 }
   0x5   : > { %s490_s20 = sshll.u32 (!%p184_p2), %s485_s19, 3  ;;  %p494_p4 = scmp.ne.s32.totalorder (!%p184_p2), %s485_s19, 0 }
   0x6   : > { %187 = sbr.rel (%p184_p2) target bundleno = 274 (0x112), region = 32  ;;  %p212_p3 = scmp.lt.s32.totalorder (!%p184_p2), %s490_s20, 15 }
   0xd   : > { %s663_s20 = smov (!%p212_p3, %s490_s20), 15  ;;  %227 = sbr.rel (%p494_p4) target bundleno = 20 (0x14), region = 36 }
   0xe   : > { %s491_s21 = sshll.u32 %s663_s20, 2  ;;  %s493_s22 = sshll.u32 %s663_s20, 3  ;;  %vm228_vm0 = vcmask (!%p494_p4), 122880   ;;  %v546_v0 = vmov (!%p494_p4), 0.0  }
   0xf   : > { %s215_s25 = scalar_lea.vmem %s656_s0, %s491_s21  ;;  %s591_s28 = scalar_lea.vmem %s659_s3, %s493_s22  ;;  %229 = vst.msk [vmem:[%s660_s4] sm:$0x1] (!%p494_p4), %vm228_vm0, %v546_v0  ;;  %230 = vst.msk [vmem:[%s661_s5] sm:$0x1] (!%p494_p4), %vm228_vm0, %v546_v0 }
  0x14 PF: > { %v533_v1 = vld [vmem:[%s657_s1] sm:$0xff]   ;;  %vm274_vm1 = vcmask 130048   ;;  %v535_v3 = vld [vmem:[%s215_s25 + $0x8] sm:$0xff]   ;;  %v536_v4 = vld [vmem:[%s215_s25 + $0x10] sm:$0xff]   ;;  %vm383_vm2 = vcmask 122880  }
  0x15   : > { %v534_v2 = vld [vmem:[%s215_s25] sm:$0xff]   ;;  %512 = vmatprep.subr.bf16.mxu0 %v533_v1  ;;  %522 = vmatprep.subr.bf16.mxu1 %v533_v1  ;;  %v537_v5 = vld [vmem:[%s215_s25 + $0x18] sm:$0xff]  }
  0x16   : > { %513 = vmatpush3.bf16.msra.mxu0 %v533_v1  ;;  %514 = vmatprep.mubr.msk.bf16.mxu0 %vm274_vm1, %v534_v2  ;;  %v495_v6 = vld [vmem:[%s658_s2] ss:$0 sm:$0xff] }
  0x17   : > { %523 = vmatpush3.bf16.msra.mxu1 %v533_v1  ;;  %518 = vmatprep.mubr.msk.bf16.mxu1 %vm274_vm1, %v536_v4 }
  0x19   : > { %515 = vmatmul.mubr.msk.bf16.vlgmr.msra.gmra.mrb[0].mxu0 %vm274_vm1, %v535_v3 }
  0x1a   : > { %519 = vmatmul.mubr.msk.bf16.vlgmr.msra.gmra.mrb[0].mxu1 %vm274_vm1, %v537_v5 }
  0xec   : > { %v516_v7 = vpop.f32.mrb[0].mxu0 }
  0xed   : > { %v330_v8 = vadd.f32 %v516_v7, %v495_v6  ;;  %v321_v9 = vpop.f32.mrb[1].mxu0  ;;  %v520_v10 = vpop.f32.mrb[0].mxu1 }
  0xee   : > { %v322_v11 = vadd.f32 %v495_v6, %v321_v9  ;;  %v517_v12 = vpop.f32.mrb[2].mxu0  ;;  %v346_v13 = vadd.f32 %v520_v10, %v495_v6  ;;  %v337_v14 = vpop.f32.mrb[1].mxu1  ;;  %v385_v9 = vld [vmem:[%s661_s5] sm:$0x1] }
  0xef   : > { %354 = vst.msk [vmem:[%s591_s28 + $0x10] sm:$0xff] %vm274_vm1, %v330_v8  ;;  %v333_v15 = vadd.f32 %v517_v12, %v495_v6  ;;  %v324_v16 = vpop.f32.mrb[3].mxu0  ;;  %v338_v17 = vadd.f32 %v495_v6, %v337_v14  ;;  %v521_v18 = vpop.f32.mrb[2].mxu1  ;;  %v388_v22 = vmul.f32 %v330_v8, %v330_v8  ;;  %v364_v26 = vsel %vm274_vm1, %v330_v8, 0.0 }
  0xf0   : > { %352 = vst.msk [vmem:[%s591_s28] sm:$0xff] %vm274_vm1, %v322_v11  ;;  %v386_v19 = vmul.f32 %v322_v11, %v322_v11  ;;  %v325_v20 = vadd.f32 %v495_v6, %v324_v16  ;;  %358 = vst.msk [vmem:[%s591_s28 + $0x30] sm:$0xff] %vm274_vm1, %v346_v13  ;;  %v340_v21 = vpop.f32.mrb[3].mxu1  ;;  %v361_v23 = vsel %vm274_vm1, %v322_v11, 0.0  ;;  %v349_v32 = vadd.f32 %v521_v18, %v495_v6 }
  0xf1   : > { %355 = vst.msk [vmem:[%s591_s28 + $0x18] sm:$0xff] %vm274_vm1, %v333_v15  ;;  %356 = vst.msk [vmem:[%s591_s28 + $0x20] sm:$0xff] %vm274_vm1, %v338_v17  ;;  %v389_v28 = vmul.f32 %v333_v15, %v333_v15  ;;  %v390_v31 = vmul.f32 %v338_v17, %v338_v17  ;;  %v341_v33 = vadd.f32 %v495_v6, %v340_v21  ;;  %v397_v36 = vsel %vm274_vm1, %v388_v22, 0.0  ;;  %v360_v6 = vld [vmem:[%s660_s4] sm:$0x1] }
  0xf2   : > { %353 = vst.msk [vmem:[%s591_s28 + $0x8] sm:$0xff] %vm274_vm1, %v325_v20  ;;  %v362_v24 = vsel %vm274_vm1, %v325_v20, 0.0  ;;  %v387_v25 = vmul.f32 %v325_v20, %v325_v20  ;;  %v394_v27 = vsel %vm274_vm1, %v386_v19, 0.0  ;;  %v366_v37 = vsel %vm274_vm1, %v333_v15, 0.0  ;;  %359 = vst.msk [vmem:[%s591_s28 + $0x38] sm:$0xff] %vm274_vm1, %v349_v32 }
  0xf3   : > { %v363_v29 = vadd.f32 %v362_v24, %v361_v23  ;;  %v368_v38 = vsel %vm274_vm1, %v338_v17, 0.0  ;;  %357 = vst.msk [vmem:[%s591_s28 + $0x28] sm:$0xff] %vm274_vm1, %v341_v33  ;;  %v399_v41 = vsel %vm274_vm1, %v389_v28, 0.0  ;;  %v401_v42 = vsel %vm274_vm1, %v390_v31, 0.0 }
  0xf4   : > { %v395_v30 = vsel %vm274_vm1, %v387_v25, 0.0  ;;  %v391_v43 = vmul.f32 %v341_v33, %v341_v33  ;;  %v392_v46 = vmul.f32 %v346_v13, %v346_v13  ;;  %v370_v47 = vsel %vm274_vm1, %v341_v33, 0.0 }
  0xf5   : > { %v365_v34 = vadd.f32 %v364_v26, %v363_v29  ;;  %v396_v35 = vadd.f32 %v395_v30, %v394_v27  ;;  %v372_v50 = vsel %vm274_vm1, %v346_v13, 0.0  ;;  %v393_v51 = vmul.f32 %v349_v32, %v349_v32 }
  0xf6   : > { %v403_v52 = vsel %vm274_vm1, %v391_v43, 0.0  ;;  %v405_v55 = vsel %vm274_vm1, %v392_v46, 0.0  ;;  %v374_v56 = vsel %vm274_vm1, %v349_v32, 0.0 }
  0xf7   : > { %v398_v39 = vadd.f32 %v397_v36, %v396_v35  ;;  %v367_v40 = vadd.f32 %v366_v37, %v365_v34  ;;  %v407_v59 = vsel %vm274_vm1, %v393_v51, 0.0 }
  0xf9   : > { %v369_v44 = vadd.f32 %v368_v38, %v367_v40  ;;  %v400_v45 = vadd.f32 %v399_v41, %v398_v39 }
  0xfb   : > { %v402_v48 = vadd.f32 %v401_v42, %v400_v45  ;;  %v371_v49 = vadd.f32 %v370_v47, %v369_v44 }
  0xfd   : > { %v373_v53 = vadd.f32 %v372_v50, %v371_v49  ;;  %v404_v54 = vadd.f32 %v403_v52, %v402_v48 }
  0xff   : > { %v375_v57 = vadd.f32 %v374_v56, %v373_v53  ;;  %v406_v58 = vadd.f32 %v405_v55, %v404_v54 }
 0x101   : > { %v376_v60 = vrot.slane %v375_v57, 4  ;;  %v408_v61 = vadd.f32 %v407_v59, %v406_v58 }
 0x103   : > { %v377_v62 = vadd.f32 %v376_v60, %v375_v57  ;;  %v409_v63 = vrot.slane %v408_v61, 4 }
 0x105   : > { %v378_v0 = vrot.slane %v377_v62, 2  ;;  %v410_v1 = vadd.f32 %v409_v63, %v408_v61 }
 0x107   : > { %v379_v2 = vadd.f32 %v378_v0, %v377_v62  ;;  %v411_v3 = vrot.slane %v410_v1, 2 }
 0x109   : > { %v380_v4 = vrot.slane %v379_v2, 1  ;;  %v412_v5 = vadd.f32 %v411_v3, %v410_v1 }
 0x10b   : > { %v381_v7 = vadd.f32 %v380_v4, %v379_v2  ;;  %v413_v8 = vrot.slane %v412_v5, 1 }
 0x10d   : > { %v382_v10 = vadd.f32 %v381_v7, %v360_v6  ;;  %v414_v11 = vadd.f32 %v413_v8, %v412_v5 }
 0x10f   : > { %384 = vst.msk [vmem:[%s660_s4] sm:$0x1] %vm383_vm2, %v382_v10  ;;  %v415_v12 = vadd.f32 %v414_v11, %v385_v9 }
 0x111   : > { %416 = vst.msk [vmem:[%s661_s5] sm:$0x1] %vm383_vm2, %v415_v12 }
 0x112 PF: > { %s16_s18 = sadd.s32 1, %s544_s18  }
 0x113   : > { %p13_p5 = scmp.ge.s32.totalorder %s16_s18, 4  }
 0x115   :  { %15 = sbr.rel (!%p13_p5) target bundleno = 1 (0x1), region = 82 }

// kernel: mhca_block_forward.9
= control target key start
LH: loop header
LB: loop body
LE: loop exit
PB: predicated region body
PF: predicated region fallthrough
CT: control target
= control target key end

     0   :  { %s668_s21 = smov 0   ;;  %s733_s0 = inlined_call_operand.vmem [shape: f32[128,16], index: 0, kind: input, shape index: {}]   ;;  %s734_s1 = inlined_call_operand.vmem [shape: f32[1,16], index: 1, kind: input, shape index: {}]   ;;  %s735_s2 = inlined_call_operand.vmem [shape: f32[1,16], index: 2, kind: input, shape index: {}]   ;;  %s736_s3 = inlined_call_operand.vmem [shape: bf16[16,64], index: 3, kind: input, shape index: {}]   ;;  %s737_s4 = inlined_call_operand.vmem [shape: f32[1,64], index: 4, kind: input, shape index: {}]   ;;  %s738_s5 = inlined_call_operand.vmem [shape: f32[128,64], index: 5, kind: input, shape index: {}]   ;;  %s739_s6 = inlined_call_operand.vmem [shape: f32[128,64], index: 6, kind: output, shape index: {}]  }
   0x1 LB: > { %s546_s22 = sadd.s32 4294967295, %s631_s21   ;;  %p550_p0 = scmp.ge.s32.totalorder %s631_s21, 1  ;;  %s631_s21 = sphi %s668_s21, %s16_s21  }
   0x2   : > { %p224_p1 = scmp.lt.s32.totalorder %s631_s21, 3 }
   0x4   : > { %p225_p2 = pnand %p550_p0, %p224_p1 }
   0x5   : > { %v592_v0 = vld [vmem:[%s736_s3] sm:$0xff] (!%p225_p2)   ;;  %s551_s25 = sshll.u32 (!%p225_p2), %s546_s22, 3  ;;  %vm375_vm0 = vcmask (!%p225_p2), 130048   ;;  %vm469_vm1 = vcmask (!%p225_p2), 523264  }
   0x6   : > { %228 = sbr.rel (%p225_p2) target bundleno = 278 (0x116), region = 44  ;;  %p260_p3 = scmp.lt.s32.totalorder (!%p225_p2), %s551_s25, 15  ;;  %572 = vmatprep.subr.bf16.mxu0 (!%p225_p2), %v592_v0  ;;  %582 = vmatprep.subr.bf16.mxu1 (!%p225_p2), %v592_v0  ;;  %v557_v1 = vld [vmem:[%s734_s1] ss:$0 sm:$0xff] (!%p225_p2) }
   0x7   : > { %573 = vmatpush3.bf16.msra.mxu0 (!%p225_p2), %v592_v0  ;;  %583 = vmatpush3.bf16.msra.mxu1 (!%p225_p2), %v592_v0  ;;  %v558_v2 = vld [vmem:[%s735_s2] ss:$0 sm:$0xff] (!%p225_p2) }
   0xd   : > { %s741_s25 = smov (!%p260_p3, %s551_s25), 15 }
   0xe   : > { %s679_s26 = sshll.u32 %s741_s25, 3 }
   0xf   : > { %s263_s7 = scalar_lea.vmem %s733_s0, %s679_s26  ;;  %s695_s12 = scalar_lea.vmem %s738_s5, %s679_s26 }
  0x10   : > { %v278_v3 = vld [vmem:[%s263_s7] sm:$0xff]  ;;  %v279_v4 = vld [vmem:[%s263_s7 + $0x8] sm:$0xff]  ;;  %v280_v10 = vld [vmem:[%s263_s7 + $0x10] sm:$0xff]  ;;  %s706_s17 = scalar_lea.vmem %s739_s6, %s679_s26 }
  0x11   : > { %v282_v5 = vld [vmem:[%s263_s7 + $0x20] sm:$0xff]  ;;  %v293_v6 = vmul.f32 %v557_v1, %v278_v3  ;;  %v294_v7 = vmul.f32 %v557_v1, %v279_v4  ;;  %v283_v8 = vld [vmem:[%s263_s7 + $0x28] sm:$0xff]  ;;  %v281_v11 = vld [vmem:[%s263_s7 + $0x18] sm:$0xff]  ;;  %v295_v13 = vmul.f32 %v557_v1, %v280_v10 }
  0x12   : > { %v297_v9 = vmul.f32 %v557_v1, %v282_v5  ;;  %v298_v12 = vmul.f32 %v557_v1, %v283_v8  ;;  %v296_v14 = vmul.f32 %v557_v1, %v281_v11  ;;  %v284_v15 = vld [vmem:[%s263_s7 + $0x30] sm:$0xff]  ;;  %v285_v16 = vld [vmem:[%s263_s7 + $0x38] sm:$0xff] }
  0x13   : > { %v308_v17 = vadd.f32 %v558_v2, %v293_v6  ;;  %v309_v18 = vadd.f32 %v558_v2, %v294_v7  ;;  %v299_v20 = vmul.f32 %v557_v1, %v284_v15  ;;  %v310_v22 = vadd.f32 %v558_v2, %v295_v13  ;;  %v559_v7 = vld [vmem:[%s737_s4] ss:$0 sm:$0xff] }
  0x14   : > { %v312_v19 = vadd.f32 %v558_v2, %v297_v9  ;;  %v313_v21 = vadd.f32 %v558_v2, %v298_v12  ;;  %v311_v23 = vadd.f32 %v558_v2, %v296_v14  ;;  %v300_v24 = vmul.f32 %v557_v1, %v285_v16  ;;  %v455_v9 = vld [vmem:[%s695_s12 + $0x10] sm:$0xff]  ;;  %v453_v12 = vld [vmem:[%s695_s12] sm:$0xff] }
  0x15   : > { %v316_v25 = vsub.f32 0.0, %v308_v17  ;;  %v317_v26 = vsub.f32 0.0, %v309_v18  ;;  %v314_v28 = vadd.f32 %v558_v2, %v299_v20  ;;  %v318_v30 = vsub.f32 0.0, %v310_v22  ;;  %v459_v14 = vld [vmem:[%s695_s12 + $0x30] sm:$0xff]  ;;  %v456_v17 = vld [vmem:[%s695_s12 + $0x18] sm:$0xff] }
  0x16   : > { %v320_v27 = vsub.f32 0.0, %v312_v19  ;;  %v321_v29 = vsub.f32 0.0, %v313_v21  ;;  %v319_v31 = vsub.f32 0.0, %v311_v23  ;;  %v315_v32 = vadd.f32 %v558_v2, %v300_v24  ;;  %v457_v21 = vld [vmem:[%s695_s12 + $0x20] sm:$0xff]  ;;  %v454_v24 = vld [vmem:[%s695_s12 + $0x8] sm:$0xff] }
  0x17   : > { %v324_v33 = vmul.f32 1.442695, %v316_v25  ;;  %v326_v34 = vmul.f32 1.442695, %v317_v26  ;;  %v328_v37 = vmul.f32 1.442695, %v318_v30 }
  0x18   : > { %v332_v35 = vmul.f32 1.442695, %v320_v27  ;;  %v334_v36 = vmul.f32 1.442695, %v321_v29  ;;  %v322_v38 = vsub.f32 0.0, %v314_v28  ;;  %v323_v39 = vsub.f32 0.0, %v315_v32 }
  0x19   : > { %593 = vpow2.f32 %v324_v33  ;;  %v330_v40 = vmul.f32 1.442695, %v319_v31  ;;  %v460_v28 = vld [vmem:[%s695_s12 + $0x38] sm:$0xff] }
  0x1a   : > { %595 = vpow2.f32 %v326_v34  ;;  %v336_v41 = vmul.f32 1.442695, %v322_v38  ;;  %v338_v42 = vmul.f32 1.442695, %v323_v39  ;;  %v458_v34 = vld [vmem:[%s695_s12 + $0x28] sm:$0xff] }
  0x1b   : > { %597 = vpow2.f32 %v332_v35 }
  0x1c   : > { %599 = vpow2.f32 %v334_v36 }
  0x1d   : > { %601 = vpow2.f32 %v328_v37 }
  0x1e   : > { %603 = vpow2.f32 %v330_v40 }
  0x1f   : > { %605 = vpow2.f32 %v336_v41 }
  0x20   : > { %607 = vpow2.f32 %v338_v42 }
  0x23   : > { %v594_v43 = vpop.eup %593 }
  0x24   : > { %v596_v44 = vpop.eup %595  ;;  %v340_v45 = vadd.f32 1.0, %v594_v43 }
  0x25   : > { %v598_v46 = vpop.eup %597  ;;  %v341_v47 = vadd.f32 1.0, %v596_v44 }
  0x26   : > { %v600_v48 = vpop.eup %599  ;;  %609 = vrcp.f32 %v340_v45  ;;  %v344_v49 = vadd.f32 1.0, %v598_v46 }
  0x27   : > { %v602_v50 = vpop.eup %601  ;;  %611 = vrcp.f32 %v341_v47  ;;  %v345_v51 = vadd.f32 1.0, %v600_v48 }
  0x28   : > { %v604_v52 = vpop.eup %603  ;;  %613 = vrcp.f32 %v344_v49  ;;  %v342_v53 = vadd.f32 1.0, %v602_v50 }
  0x29   : > { %v606_v54 = vpop.eup %605  ;;  %615 = vrcp.f32 %v345_v51  ;;  %v343_v55 = vadd.f32 1.0, %v604_v52 }
  0x2a   : > { %v608_v56 = vpop.eup %607  ;;  %617 = vrcp.f32 %v342_v53  ;;  %v346_v57 = vadd.f32 1.0, %v606_v54 }
  0x2b   : > { %619 = vrcp.f32 %v343_v55  ;;  %v347_v58 = vadd.f32 1.0, %v608_v56 }
  0x2c   : > { %621 = vrcp.f32 %v346_v57 }
  0x2d   : > { %623 = vrcp.f32 %v347_v58 }
  0x30   : > { %v610_v59 = vpop.eup %609 }
  0x31   : > { %v612_v60 = vpop.eup %611 }
  0x32   : > { %v614_v61 = vpop.eup %613  ;;  %v356_v62 = vpack.c.bf16 %v612_v60, %v610_v59 }
  0x33   : > { %v616_v63 = vpop.eup %615 }
  0x34   : > { %v618_v0 = vpop.eup %617  ;;  %574 = vmatprep.mubr.msk.bf16.mxu0 %vm375_vm0, %v356_v62  ;;  %v358_v1 = vpack.c.bf16 %v616_v63, %v614_v61 }
  0x35   : > { %v620_v2 = vpop.eup %619 }
  0x36   : > { %v622_v3 = vpop.eup %621  ;;  %578 = vmatprep.mubr.msk.bf16.mxu1 %vm375_vm0, %v358_v1  ;;  %v357_v4 = vpack.c.bf16 %v620_v2, %v618_v0 }
  0x37   : > { %v624_v5 = vpop.eup %623 }
  0x38   : > { %575 = vmatmul.mubr.msk.bf16.vlgmr.msra.gmra.mrb[0].mxu0 %vm375_vm0, %v357_v4  ;;  %v359_v6 = vpack.c.bf16 %v624_v5, %v622_v3 }
  0x3a   : > { %579 = vmatmul.mubr.msk.bf16.vlgmr.msra.gmra.mrb[0].mxu1 %vm375_vm0, %v359_v6 }
 0x10b   : > { %v576_v8 = vpop.f32.mrb[0].mxu0 }
 0x10c   : > { %v431_v10 = vadd.f32 %v576_v8, %v559_v7  ;;  %v422_v11 = vpop.f32.mrb[1].mxu0 }
 0x10d   : > { %v580_v13 = vpop.f32.mrb[0].mxu1  ;;  %v423_v15 = vadd.f32 %v559_v7, %v422_v11  ;;  %v577_v16 = vpop.f32.mrb[2].mxu0 }
 0x10e   : > { %v463_v18 = vmul.f32 %v455_v9, %v431_v10  ;;  %v447_v19 = vadd.f32 %v580_v13, %v559_v7  ;;  %v438_v20 = vpop.f32.mrb[1].mxu1  ;;  %v434_v22 = vadd.f32 %v577_v16, %v559_v7  ;;  %v425_v23 = vpop.f32.mrb[3].mxu0 }
 0x10f   : > { %v461_v25 = vmul.f32 %v453_v12, %v423_v15  ;;  %v439_v26 = vadd.f32 %v559_v7, %v438_v20  ;;  %v581_v27 = vpop.f32.mrb[2].mxu1  ;;  %v426_v29 = vadd.f32 %v559_v7, %v425_v23 }
 0x110   : > { %472 = vst.msk [vmem:[%s706_s17 + $0x10] sm:$0xff] %vm469_vm1, %v463_v18  ;;  %v467_v30 = vmul.f32 %v459_v14, %v447_v19  ;;  %v464_v31 = vmul.f32 %v456_v17, %v434_v22  ;;  %v450_v32 = vadd.f32 %v581_v27, %v559_v7  ;;  %v441_v33 = vpop.f32.mrb[3].mxu1 }
 0x111   : > { %470 = vst.msk [vmem:[%s706_s17] sm:$0xff] %vm469_vm1, %v461_v25  ;;  %v465_v35 = vmul.f32 %v457_v21, %v439_v26  ;;  %v462_v36 = vmul.f32 %v454_v24, %v426_v29  ;;  %v442_v37 = vadd.f32 %v559_v7, %v441_v33 }
 0x112   : > { %476 = vst.msk [vmem:[%s706_s17 + $0x30] sm:$0xff] %vm469_vm1, %v467_v30  ;;  %473 = vst.msk [vmem:[%s706_s17 + $0x18] sm:$0xff] %vm469_vm1, %v464_v31  ;;  %v468_v38 = vmul.f32 %v460_v28, %v450_v32 }
 0x113   : > { %474 = vst.msk [vmem:[%s706_s17 + $0x20] sm:$0xff] %vm469_vm1, %v465_v35  ;;  %471 = vst.msk [vmem:[%s706_s17 + $0x8] sm:$0xff] %vm469_vm1, %v462_v36  ;;  %v466_v39 = vmul.f32 %v458_v34, %v442_v37 }
 0x114   : > { %477 = vst.msk [vmem:[%s706_s17 + $0x38] sm:$0xff] %vm469_vm1, %v468_v38 }
 0x115   : > { %475 = vst.msk [vmem:[%s706_s17 + $0x28] sm:$0xff] %vm469_vm1, %v466_v39 }
 0x116 PF: > { %s16_s21 = sadd.s32 1, %s631_s21  }
 0x117   : > { %p13_p4 = scmp.ge.s32.totalorder %s16_s21, 4  }
 0x119   :  { %15 = sbr.rel (!%p13_p4) target bundleno = 1 (0x1), region = 77 }

</bundles_post_ra>
